<compile_context>
chip_gen: v6e
topology: v6e:2x2x1
jax: 0.10.0
libtpu: 0.0.40
codegen_flags: <defaults>
</compile_context>

<pallas_src>
import functools
import math

import jax
import jax.numpy as jnp
from jax.experimental import pallas as pl
from jax.experimental.pallas import tpu as pltpu


MXU_DTYPE = jnp.bfloat16   # matmul-operand dtype (set to jnp.float32 for bit-closer numerics)
LN_EPS = 1e-5


# ---------------------------------------------------------------------------
# Fused decoder-stack kernel: grid = (batch, layer)
# ---------------------------------------------------------------------------

def _decoder_stack_kernel(
    tgt_ref, mem_ref,
    sa_wqkv_ref, sa_bqkv_ref, sa_wout_ref, sa_bout_ref,
    ca_wqkv_ref, ca_bqkv_ref, ca_wout_ref, ca_bout_ref,
    w1_ref, b1_ref, w2_ref, b2_ref,
    ln1_g_ref, ln1_b_ref, ln2_g_ref, ln2_b_ref, ln3_g_ref, ln3_b_ref,
    out_ref,
    act_ref,
    *, nhead):
    layer = pl.program_id(1)

    # Initialize the VMEM-resident activation from tgt on the first layer.
    @pl.when(layer == 0)
    def _():
        act_ref[...] = tgt_ref[0].astype(jnp.float32)

    x = act_ref[...]                        # (T, E) fp32 running activation
    mem = mem_ref[0].astype(jnp.float32)    # (S, E)

    e = x.shape[-1]
    dh = e // nhead
    scale = 1.0 / math.sqrt(dh)

    def dot32(a, b):
        # bf16 MXU operands, fp32 accumulation.
        return jnp.dot(a.astype(MXU_DTYPE), b.astype(MXU_DTYPE),
                       preferred_element_type=jnp.float32)

    def layer_norm(y, g_ref, b_ref):        # fp32 math, biased var, eps=1e-5
        mu = jnp.mean(y, axis=-1, keepdims=True)
        var = jnp.mean(jnp.square(y - mu), axis=-1, keepdims=True)
        return (y - mu) * jax.lax.rsqrt(var + LN_EPS) * g_ref[0] + b_ref[0]

    def mha(xq, xkv, is_self, wqkv_ref, bqkv_ref, wout_ref, bout_ref):
        wqkv = wqkv_ref[0]                  # (E, 3E) bf16, pre-transposed
        bqkv = bqkv_ref[0]                  # (1, 3E) fp32
        if is_self:
            qkv = dot32(xq, wqkv) + bqkv    # single fused QKV matmul
            q, k, v = qkv[:, :e], qkv[:, e:2 * e], qkv[:, 2 * e:]
        else:
            q = dot32(xq, wqkv[:, :e]) + bqkv[:, :e]
            kv = dot32(xkv, wqkv[:, e:]) + bqkv[:, e:]
            k, v = kv[:, :e], kv[:, e:]
        wout = wout_ref[0]                  # (E, E) bf16, pre-transposed
        acc = jnp.zeros((xq.shape[0], e), jnp.float32)
        for h in range(nhead):              # static unroll; heads stay in vregs
            sl = slice(h * dh, (h + 1) * dh)
            qh, kh, vh = q[:, sl], k[:, sl], v[:, sl]
            # scores = q @ k^T (contract head dim; no explicit transpose)
            s = jax.lax.dot_general(
                qh.astype(MXU_DTYPE), kh.astype(MXU_DTYPE),
                dimension_numbers=(((1,), (1,)), ((), ())),
                preferred_element_type=jnp.float32) * scale
            s = s - jnp.max(s, axis=-1, keepdims=True)
            p = jnp.exp(s)
            p = p * pl.reciprocal(jnp.sum(p, axis=-1, keepdims=True), approx=True)
            oh = dot32(p, vh)                           # (Tq, dh)
            acc = acc + dot32(oh, wout[sl, :])          # out_proj fused, summed over heads
        return acc + bout_ref[0]

    # --- self-attention block + residual + norm1 ---
    sa = mha(x, x, True, sa_wqkv_ref, sa_bqkv_ref, sa_wout_ref, sa_bout_ref)
    x = layer_norm(x + sa, ln1_g_ref, ln1_b_ref)
    # --- cross-attention block + residual + norm2 ---
    ca = mha(x, mem, False, ca_wqkv_ref, ca_bqkv_ref, ca_wout_ref, ca_bout_ref)
    x = layer_norm(x + ca, ln2_g_ref, ln2_b_ref)
    # --- feed-forward (linear1 -> ReLU -> linear2) + residual + norm3 ---
    h1 = jnp.maximum(dot32(x, w1_ref[0]) + b1_ref[0], 0.0)
    ff = dot32(h1, w2_ref[0]) + b2_ref[0]
    x = layer_norm(x + ff, ln3_g_ref, ln3_b_ref)

    act_ref[...] = x
    out_ref[0] = x.astype(out_ref.dtype)


# Optional final LayerNorm (TransformerDecoder norm=None in this config).
def _layernorm_kernel(x_ref, g_ref, b_ref, o_ref):
    x = x_ref[...].astype(jnp.float32)
    mu = jnp.mean(x, axis=-1, keepdims=True)
    var = jnp.mean(jnp.square(x - mu), axis=-1, keepdims=True)
    o_ref[...] = ((x - mu) * jax.lax.rsqrt(var + LN_EPS)
                  * g_ref[...] + b_ref[...]).astype(o_ref.dtype)


# ---------------------------------------------------------------------------
# Parameter packing: pre-transpose + stack per-layer weights once (not hot path)
# ---------------------------------------------------------------------------

_PARAM_ORDER = ("sa_wqkv", "sa_bqkv", "sa_wout", "sa_bout",
                "ca_wqkv", "ca_bqkv", "ca_wout", "ca_bout",
                "w1", "b1", "w2", "b2",
                "ln1_g", "ln1_b", "ln2_g", "ln2_b", "ln3_g", "ln3_b")


def pack_decoder_params(layer_params, mxu_dtype=MXU_DTYPE):
    """Takes per-layer dicts in PyTorch layout -> stacked, pre-transposed arrays."""
    def stack(fn, dtype=jnp.float32):
        return jnp.stack([jnp.asarray(fn(p), jnp.float32) for p in layer_params]).astype(dtype)

    row = lambda v: v[None, :]
    return {
        "sa_wqkv": stack(lambda p: p["self_attn"]["in_proj_weight"].T, mxu_dtype),
        "sa_bqkv": stack(lambda p: row(p["self_attn"]["in_proj_bias"])),
        "sa_wout": stack(lambda p: p["self_attn"]["out_proj_weight"].T, mxu_dtype),
        "sa_bout": stack(lambda p: row(p["self_attn"]["out_proj_bias"])),
        "ca_wqkv": stack(lambda p: p["cross_attn"]["in_proj_weight"].T, mxu_dtype),
        "ca_bqkv": stack(lambda p: row(p["cross_attn"]["in_proj_bias"])),
        "ca_wout": stack(lambda p: p["cross_attn"]["out_proj_weight"].T, mxu_dtype),
        "ca_bout": stack(lambda p: row(p["cross_attn"]["out_proj_bias"])),
        "w1": stack(lambda p: p["linear1_w"].T, mxu_dtype),
        "b1": stack(lambda p: row(p["linear1_b"])),
        "w2": stack(lambda p: p["linear2_w"].T, mxu_dtype),
        "b2": stack(lambda p: row(p["linear2_b"])),
        "ln1_g": stack(lambda p: row(p["norm1_w"])),
        "ln1_b": stack(lambda p: row(p["norm1_b"])),
        "ln2_g": stack(lambda p: row(p["norm2_w"])),
        "ln2_b": stack(lambda p: row(p["norm2_b"])),
        "ln3_g": stack(lambda p: row(p["norm3_w"])),
        "ln3_b": stack(lambda p: row(p["norm3_b"])),
    }


# ---------------------------------------------------------------------------
# Forward: one pallas_call for the whole decoder stack
# ---------------------------------------------------------------------------

@functools.partial(jax.jit, static_argnames=("nhead",))
def transformer_decoder(tgt, memory, packed, nhead, final_norm=None):
    T, B, E = tgt.shape
    S = memory.shape[0]
    L = packed["sa_wqkv"].shape[0]

    # One-time seq-first -> batch-major glue (outside the fused kernel).
    tgt_b = jnp.transpose(tgt, (1, 0, 2))      # (B, T, E)
    mem_b = jnp.transpose(memory, (1, 0, 2))   # (B, S, E)

    weight_inputs = [packed[k] for k in _PARAM_ORDER]
    weight_specs = [
        pl.BlockSpec((1,) + packed[k].shape[1:], lambda b, l: (l, 0, 0))
        for k in _PARAM_ORDER
    ]

    out = pl.pallas_call(
        functools.partial(_decoder_stack_kernel, nhead=nhead),
        out_shape=jax.ShapeDtypeStruct((B, T, E), tgt.dtype),
        grid_spec=pltpu.PrefetchScalarGridSpec(
            num_scalar_prefetch=0,
            grid=(B, L),                       # batch (parallel), layer (sequential)
            in_specs=[pl.BlockSpec((1, T, E), lambda b, l: (b, 0, 0)),
                      pl.BlockSpec((1, S, E), lambda b, l: (b, 0, 0))]
                     + weight_specs,
            out_specs=pl.BlockSpec((1, T, E), lambda b, l: (b, 0, 0)),
            scratch_shapes=[pltpu.VMEM((T, E), jnp.float32)]),
        compiler_params=pltpu.CompilerParams(
            dimension_semantics=("parallel", "arbitrary"),
            vmem_limit_bytes=32 * 1024 * 1024),
    )(tgt_b, mem_b, *weight_inputs)

    out = jnp.transpose(out, (1, 0, 2))        # back to (T, B, E) seq-first

    if final_norm is not None:                 # norm=None in this config (module default)
        g = jnp.asarray(final_norm["w"], jnp.float32)[None, :]
        bb = jnp.asarray(final_norm["b"], jnp.float32)[None, :]
        flat = pl.pallas_call(
            _layernorm_kernel,
            out_shape=jax.ShapeDtypeStruct((T * B, E), out.dtype),
            in_specs=[pl.BlockSpec(memory_space=pltpu.MemorySpace.VMEM)] * 3,
            out_specs=pl.BlockSpec(memory_space=pltpu.MemorySpace.VMEM),
        )(out.reshape(T * B, E), g, bb)
        out = flat.reshape(T, B, E)
    return out


# ---------------------------------------------------------------------------
# Deterministic parameter init (shapes follow nn.TransformerDecoderLayer)
# ---------------------------------------------------------------------------

def _xavier_uniform(key, shape):
    fan_out, fan_in = shape
    limit = math.sqrt(6.0 / (fan_in + fan_out))
    return jax.random.uniform(key, shape, jnp.float32, -limit, limit)


def init_decoder_params(key, num_layers, d_model, dim_feedforward):
    layers = []
    for _ in range(num_layers):
        key, k0, k1, k2, k3, k4, k5 = jax.random.split(key, 7)
        layers.append({
            "self_attn": {
                "in_proj_weight": _xavier_uniform(k0, (3 * d_model, d_model)),
                "in_proj_bias": jnp.zeros((3 * d_model,), jnp.float32),
                "out_proj_weight": _xavier_uniform(k1, (d_model, d_model)),
                "out_proj_bias": jnp.zeros((d_model,), jnp.float32),
            },
            "cross_attn": {
                "in_proj_weight": _xavier_uniform(k2, (3 * d_model, d_model)),
                "in_proj_bias": jnp.zeros((3 * d_model,), jnp.float32),
                "out_proj_weight": _xavier_uniform(k3, (d_model, d_model)),
                "out_proj_bias": jnp.zeros((d_model,), jnp.float32),
            },
            "linear1_w": _xavier_uniform(k4, (dim_feedforward, d_model)),
            "linear1_b": jnp.zeros((dim_feedforward,), jnp.float32),
            "linear2_w": _xavier_uniform(k5, (d_model, dim_feedforward)),
            "linear2_b": jnp.zeros((d_model,), jnp.float32),
            "norm1_w": jnp.ones((d_model,), jnp.float32),
            "norm1_b": jnp.zeros((d_model,), jnp.float32),
            "norm2_w": jnp.ones((d_model,), jnp.float32),
            "norm2_b": jnp.zeros((d_model,), jnp.float32),
            "norm3_w": jnp.ones((d_model,), jnp.float32),
            "norm3_b": jnp.zeros((d_model,), jnp.float32),
        })
    return layers


# ---------------------------------------------------------------------------
# Main
# ---------------------------------------------------------------------------

if __name__ == "__main__":
    d_model, nhead, dim_feedforward, num_layers = 32, 4, 64, 2
    T, S, B = 8, 10, 2  # tgt seq len, memory seq len, batch

    key = jax.random.PRNGKey(0)
    k_tgt, k_mem, k_par = jax.random.split(key, 3)
    tgt = jax.random.normal(k_tgt, (T, B, d_model), jnp.float32)
    memory = jax.random.normal(k_mem, (S, B, d_model), jnp.float32)

    layer_params = init_decoder_params(k_par, num_layers, d_model, dim_feedforward)
    packed = pack_decoder_params(layer_params)   # pre-transpose/stack once

    out = transformer_decoder(tgt, memory, packed, nhead=nhead)
    out = jax.block_until_ready(out)

    assert out.shape == (T, B, d_model)
    assert bool(jnp.all(jnp.isfinite(out)))
    print("KERNEL_OK")
</pallas_src>

<mosaic_0001>
module attributes {stable_mosaic.version = 11 : i64} {
  func.func @_decoder_stack_kernel(%arg0: i32, %arg1: i32, %arg2: memref<1x8x32xf32, #tpu.memory_space<vmem>>, %arg3: memref<1x10x32xf32, #tpu.memory_space<vmem>>, %arg4: memref<1x32x96xbf16, #tpu.memory_space<vmem>>, %arg5: memref<1x1x96xf32, #tpu.memory_space<vmem>>, %arg6: memref<1x32x32xbf16, #tpu.memory_space<vmem>>, %arg7: memref<1x1x32xf32, #tpu.memory_space<vmem>>, %arg8: memref<1x32x96xbf16, #tpu.memory_space<vmem>>, %arg9: memref<1x1x96xf32, #tpu.memory_space<vmem>>, %arg10: memref<1x32x32xbf16, #tpu.memory_space<vmem>>, %arg11: memref<1x1x32xf32, #tpu.memory_space<vmem>>, %arg12: memref<1x32x64xbf16, #tpu.memory_space<vmem>>, %arg13: memref<1x1x64xf32, #tpu.memory_space<vmem>>, %arg14: memref<1x64x32xbf16, #tpu.memory_space<vmem>>, %arg15: memref<1x1x32xf32, #tpu.memory_space<vmem>>, %arg16: memref<1x1x32xf32, #tpu.memory_space<vmem>>, %arg17: memref<1x1x32xf32, #tpu.memory_space<vmem>>, %arg18: memref<1x1x32xf32, #tpu.memory_space<vmem>>, %arg19: memref<1x1x32xf32, #tpu.memory_space<vmem>>, %arg20: memref<1x1x32xf32, #tpu.memory_space<vmem>>, %arg21: memref<1x1x32xf32, #tpu.memory_space<vmem>>, %arg22: memref<1x8x32xf32, #tpu.memory_space<vmem>>, %arg23: memref<8x32xf32, #tpu.memory_space<vmem>>) attributes {dimension_semantics = [#tpu.dimension_semantics<parallel>, #tpu.dimension_semantics<arbitrary>], iteration_bounds = array<i64: 2, 2>, scalar_prefetch = 0 : i64, scratch_operands = 1 : i64, tpu.core_type = #tpu.core_type<tc>, window_params = [{transform_indices = @transform_0, window_bounds = array<i64: 1, 8, 32>}, {transform_indices = @transform_1, window_bounds = array<i64: 1, 10, 32>}, {transform_indices = @transform_2, window_bounds = array<i64: 1, 32, 96>}, {transform_indices = @transform_3, window_bounds = array<i64: 1, 1, 96>}, {transform_indices = @transform_4, window_bounds = array<i64: 1, 32, 32>}, {transform_indices = @transform_5, window_bounds = array<i64: 1, 1, 32>}, {transform_indices = @transform_6, window_bounds = array<i64: 1, 32, 96>}, {transform_indices = @transform_7, window_bounds = array<i64: 1, 1, 96>}, {transform_indices = @transform_8, window_bounds = array<i64: 1, 32, 32>}, {transform_indices = @transform_9, window_bounds = array<i64: 1, 1, 32>}, {transform_indices = @transform_10, window_bounds = array<i64: 1, 32, 64>}, {transform_indices = @transform_11, window_bounds = array<i64: 1, 1, 64>}, {transform_indices = @transform_12, window_bounds = array<i64: 1, 64, 32>}, {transform_indices = @transform_13, window_bounds = array<i64: 1, 1, 32>}, {transform_indices = @transform_14, window_bounds = array<i64: 1, 1, 32>}, {transform_indices = @transform_15, window_bounds = array<i64: 1, 1, 32>}, {transform_indices = @transform_16, window_bounds = array<i64: 1, 1, 32>}, {transform_indices = @transform_17, window_bounds = array<i64: 1, 1, 32>}, {transform_indices = @transform_18, window_bounds = array<i64: 1, 1, 32>}, {transform_indices = @transform_19, window_bounds = array<i64: 1, 1, 32>}, {transform_indices = @transform_20, window_bounds = array<i64: 1, 8, 32>}]} {
    %c0_i32 = arith.constant 0 : i32
    %0 = arith.cmpi eq, %arg1, %c0_i32 : i32
    %1 = arith.extui %0 : i1 to i32
    %c0_i32_0 = arith.constant 0 : i32
    %2 = arith.cmpi ne, %1, %c0_i32_0 : i32
    scf.if %2 {
      %c0_134 = arith.constant 0 : index
      %c0_135 = arith.constant 0 : index
      %c0_136 = arith.constant 0 : index
      %352 = vector.load %arg2[%c0_134, %c0_135, %c0_136] : memref<1x8x32xf32, #tpu.memory_space<vmem>>, vector<1x8x32xf32>
      %353 = vector.shape_cast %352 : vector<1x8x32xf32> to vector<8x32xf32>
      %c0_137 = arith.constant 0 : index
      %c0_138 = arith.constant 0 : index
      %354 = vector.load %arg23[%c0_137, %c0_138] : memref<8x32xf32, #tpu.memory_space<vmem>>, vector<8x32xf32>
      tpu.vector_store %arg23[%c0_137, %c0_138], %353 {strides = array<i32>} : memref<8x32xf32, #tpu.memory_space<vmem>>, vector<8x32xf32>,
    } else {
    }
    %c0 = arith.constant 0 : index
    %c0_1 = arith.constant 0 : index
    %3 = vector.load %arg23[%c0, %c0_1] : memref<8x32xf32, #tpu.memory_space<vmem>>, vector<8x32xf32>
    %c0_2 = arith.constant 0 : index
    %c0_3 = arith.constant 0 : index
    %c0_4 = arith.constant 0 : index
    %4 = vector.load %arg3[%c0_2, %c0_3, %c0_4] : memref<1x10x32xf32, #tpu.memory_space<vmem>>, vector<1x10x32xf32>
    %5 = vector.shape_cast %4 : vector<1x10x32xf32> to vector<10x32xf32>
    %c0_5 = arith.constant 0 : index
    %c0_6 = arith.constant 0 : index
    %c0_7 = arith.constant 0 : index
    %6 = vector.load %arg4[%c0_5, %c0_6, %c0_7] : memref<1x32x96xbf16, #tpu.memory_space<vmem>>, vector<1x32x96xbf16>
    %7 = vector.shape_cast %6 : vector<1x32x96xbf16> to vector<32x96xbf16>
    %c0_8 = arith.constant 0 : index
    %c0_9 = arith.constant 0 : index
    %c0_10 = arith.constant 0 : index
    %8 = vector.load %arg5[%c0_8, %c0_9, %c0_10] : memref<1x1x96xf32, #tpu.memory_space<vmem>>, vector<1x1x96xf32>
    %9 = vector.shape_cast %8 : vector<1x1x96xf32> to vector<1x96xf32>
    %10 = arith.truncf %3 : vector<8x32xf32> to vector<8x32xbf16>
    %cst = arith.constant dense<0.000000e+00> : vector<8x96xf32>
    %11 = tpu.matmul %10, %7, %cst {dimension_numbers = #tpu.dot_dimension_numbers<[1], [0], [0], [1], [0, 0, 1, 1], [], []>} : vector<8x32xbf16>, vector<32x96xbf16>, vector<8x96xf32> -> vector<8x96xf32>
    %12 = vector.broadcast %9 : vector<1x96xf32> to vector<8x96xf32>
    %13 = arith.addf %11, %12 : vector<8x96xf32>
    %14 = vector.extract_strided_slice %13 {offsets = [0, 0], sizes = [8, 32], strides = [1, 1]} : vector<8x96xf32> to vector<8x32xf32>
    %15 = vector.extract_strided_slice %13 {offsets = [0, 32], sizes = [8, 32], strides = [1, 1]} : vector<8x96xf32> to vector<8x32xf32>
    %16 = vector.extract_strided_slice %13 {offsets = [0, 64], sizes = [8, 32], strides = [1, 1]} : vector<8x96xf32> to vector<8x32xf32>
    %c0_11 = arith.constant 0 : index
    %c0_12 = arith.constant 0 : index
    %c0_13 = arith.constant 0 : index
    %17 = vector.load %arg6[%c0_11, %c0_12, %c0_13] : memref<1x32x32xbf16, #tpu.memory_space<vmem>>, vector<1x32x32xbf16>
    %18 = vector.shape_cast %17 : vector<1x32x32xbf16> to vector<32x32xbf16>
    %cst_14 = arith.constant 0.000000e+00 : f32
    %19 = vector.broadcast %cst_14 : f32 to vector<8x32xf32>
    %20 = vector.extract_strided_slice %14 {offsets = [0, 0], sizes = [8, 8], strides = [1, 1]} : vector<8x32xf32> to vector<8x8xf32>
    %21 = vector.extract_strided_slice %15 {offsets = [0, 0], sizes = [8, 8], strides = [1, 1]} : vector<8x32xf32> to vector<8x8xf32>
    %22 = vector.extract_strided_slice %16 {offsets = [0, 0], sizes = [8, 8], strides = [1, 1]} : vector<8x32xf32> to vector<8x8xf32>
    %23 = arith.truncf %20 : vector<8x8xf32> to vector<8x8xbf16>
    %24 = arith.truncf %21 : vector<8x8xf32> to vector<8x8xbf16>
    %cst_15 = arith.constant dense<0.000000e+00> : vector<8x8xf32>
    %25 = tpu.matmul %23, %24, %cst_15 {dimension_numbers = #tpu.dot_dimension_numbers<[1], [1], [0], [0], [0, 0, 1, 0], [], []>} : vector<8x8xbf16>, vector<8x8xbf16>, vector<8x8xf32> -> vector<8x8xf32>
    %cst_16 = arith.constant 0.353553385 : f32
    %26 = vector.broadcast %cst_16 : f32 to vector<8x8xf32>
    %27 = arith.mulf %25, %26 : vector<8x8xf32>
    %cst_17 = arith.constant dense<0xFF800000> : vector<8xf32>
    %28 = vector.multi_reduction <maximumf>, %27, %cst_17 [1] : vector<8x8xf32> to vector<8xf32>
    %29 = vector.shape_cast %28 : vector<8xf32> to vector<8x1xf32>
    %30 = vector.broadcast %29 : vector<8x1xf32> to vector<8x8xf32>
    %31 = arith.subf %27, %30 : vector<8x8xf32>
    %32 = math.exp %31 : vector<8x8xf32>
    %cst_18 = arith.constant dense<0.000000e+00> : vector<8xf32>
    %33 = vector.multi_reduction <add>, %32, %cst_18 [1] : vector<8x8xf32> to vector<8xf32>
    %34 = vector.shape_cast %33 : vector<8xf32> to vector<8x1xf32>
    %35 = tpu.reciprocal %34 {approx = true} : vector<8x1xf32> -> vector<8x1xf32>
    %36 = vector.broadcast %35 : vector<8x1xf32> to vector<8x8xf32>
    %37 = arith.mulf %32, %36 : vector<8x8xf32>
    %38 = arith.truncf %37 : vector<8x8xf32> to vector<8x8xbf16>
    %39 = arith.truncf %22 : vector<8x8xf32> to vector<8x8xbf16>
    %cst_19 = arith.constant dense<0.000000e+00> : vector<8x8xf32>
    %40 = tpu.matmul %38, %39, %cst_19 {dimension_numbers = #tpu.dot_dimension_numbers<[1], [0], [0], [1], [0, 0, 1, 1], [], []>} : vector<8x8xbf16>, vector<8x8xbf16>, vector<8x8xf32> -> vector<8x8xf32>
    %41 = vector.extract_strided_slice %18 {offsets = [0, 0], sizes = [8, 32], strides = [1, 1]} : vector<32x32xbf16> to vector<8x32xbf16>
    %42 = arith.truncf %40 : vector<8x8xf32> to vector<8x8xbf16>
    %cst_20 = arith.constant dense<0.000000e+00> : vector<8x32xf32>
    %43 = tpu.matmul %42, %41, %cst_20 {dimension_numbers = #tpu.dot_dimension_numbers<[1], [0], [0], [1], [0, 0, 1, 1], [], []>} : vector<8x8xbf16>, vector<8x32xbf16>, vector<8x32xf32> -> vector<8x32xf32>
    %44 = arith.addf %19, %43 : vector<8x32xf32>
    %45 = vector.extract_strided_slice %14 {offsets = [0, 8], sizes = [8, 8], strides = [1, 1]} : vector<8x32xf32> to vector<8x8xf32>
    %46 = vector.extract_strided_slice %15 {offsets = [0, 8], sizes = [8, 8], strides = [1, 1]} : vector<8x32xf32> to vector<8x8xf32>
    %47 = vector.extract_strided_slice %16 {offsets = [0, 8], sizes = [8, 8], strides = [1, 1]} : vector<8x32xf32> to vector<8x8xf32>
    %48 = arith.truncf %45 : vector<8x8xf32> to vector<8x8xbf16>
    %49 = arith.truncf %46 : vector<8x8xf32> to vector<8x8xbf16>
    %cst_21 = arith.constant dense<0.000000e+00> : vector<8x8xf32>
    %50 = tpu.matmul %48, %49, %cst_21 {dimension_numbers = #tpu.dot_dimension_numbers<[1], [1], [0], [0], [0, 0, 1, 0], [], []>} : vector<8x8xbf16>, vector<8x8xbf16>, vector<8x8xf32> -> vector<8x8xf32>
    %cst_22 = arith.constant 0.353553385 : f32
    %51 = vector.broadcast %cst_22 : f32 to vector<8x8xf32>
    %52 = arith.mulf %50, %51 : vector<8x8xf32>
    %cst_23 = arith.constant dense<0xFF800000> : vector<8xf32>
    %53 = vector.multi_reduction <maximumf>, %52, %cst_23 [1] : vector<8x8xf32> to vector<8xf32>
    %54 = vector.shape_cast %53 : vector<8xf32> to vector<8x1xf32>
    %55 = vector.broadcast %54 : vector<8x1xf32> to vector<8x8xf32>
    %56 = arith.subf %52, %55 : vector<8x8xf32>
    %57 = math.exp %56 : vector<8x8xf32>
    %cst_24 = arith.constant dense<0.000000e+00> : vector<8xf32>
    %58 = vector.multi_reduction <add>, %57, %cst_24 [1] : vector<8x8xf32> to vector<8xf32>
    %59 = vector.shape_cast %58 : vector<8xf32> to vector<8x1xf32>
    %60 = tpu.reciprocal %59 {approx = true} : vector<8x1xf32> -> vector<8x1xf32>
    %61 = vector.broadcast %60 : vector<8x1xf32> to vector<8x8xf32>
    %62 = arith.mulf %57, %61 : vector<8x8xf32>
    %63 = arith.truncf %62 : vector<8x8xf32> to vector<8x8xbf16>
    %64 = arith.truncf %47 : vector<8x8xf32> to vector<8x8xbf16>
    %cst_25 = arith.constant dense<0.000000e+00> : vector<8x8xf32>
    %65 = tpu.matmul %63, %64, %cst_25 {dimension_numbers = #tpu.dot_dimension_numbers<[1], [0], [0], [1], [0, 0, 1, 1], [], []>} : vector<8x8xbf16>, vector<8x8xbf16>, vector<8x8xf32> -> vector<8x8xf32>
    %66 = vector.extract_strided_slice %18 {offsets = [8, 0], sizes = [8, 32], strides = [1, 1]} : vector<32x32xbf16> to vector<8x32xbf16>
    %67 = arith.truncf %65 : vector<8x8xf32> to vector<8x8xbf16>
    %cst_26 = arith.constant dense<0.000000e+00> : vector<8x32xf32>
    %68 = tpu.matmul %67, %66, %cst_26 {dimension_numbers = #tpu.dot_dimension_numbers<[1], [0], [0], [1], [0, 0, 1, 1], [], []>} : vector<8x8xbf16>, vector<8x32xbf16>, vector<8x32xf32> -> vector<8x32xf32>
    %69 = arith.addf %44, %68 : vector<8x32xf32>
    %70 = vector.extract_strided_slice %14 {offsets = [0, 16], sizes = [8, 8], strides = [1, 1]} : vector<8x32xf32> to vector<8x8xf32>
    %71 = vector.extract_strided_slice %15 {offsets = [0, 16], sizes = [8, 8], strides = [1, 1]} : vector<8x32xf32> to vector<8x8xf32>
    %72 = vector.extract_strided_slice %16 {offsets = [0, 16], sizes = [8, 8], strides = [1, 1]} : vector<8x32xf32> to vector<8x8xf32>
    %73 = arith.truncf %70 : vector<8x8xf32> to vector<8x8xbf16>
    %74 = arith.truncf %71 : vector<8x8xf32> to vector<8x8xbf16>
    %cst_27 = arith.constant dense<0.000000e+00> : vector<8x8xf32>
    %75 = tpu.matmul %73, %74, %cst_27 {dimension_numbers = #tpu.dot_dimension_numbers<[1], [1], [0], [0], [0, 0, 1, 0], [], []>} : vector<8x8xbf16>, vector<8x8xbf16>, vector<8x8xf32> -> vector<8x8xf32>
    %cst_28 = arith.constant 0.353553385 : f32
    %76 = vector.broadcast %cst_28 : f32 to vector<8x8xf32>
    %77 = arith.mulf %75, %76 : vector<8x8xf32>
    %cst_29 = arith.constant dense<0xFF800000> : vector<8xf32>
    %78 = vector.multi_reduction <maximumf>, %77, %cst_29 [1] : vector<8x8xf32> to vector<8xf32>
    %79 = vector.shape_cast %78 : vector<8xf32> to vector<8x1xf32>
    %80 = vector.broadcast %79 : vector<8x1xf32> to vector<8x8xf32>
    %81 = arith.subf %77, %80 : vector<8x8xf32>
    %82 = math.exp %81 : vector<8x8xf32>
    %cst_30 = arith.constant dense<0.000000e+00> : vector<8xf32>
    %83 = vector.multi_reduction <add>, %82, %cst_30 [1] : vector<8x8xf32> to vector<8xf32>
    %84 = vector.shape_cast %83 : vector<8xf32> to vector<8x1xf32>
    %85 = tpu.reciprocal %84 {approx = true} : vector<8x1xf32> -> vector<8x1xf32>
    %86 = vector.broadcast %85 : vector<8x1xf32> to vector<8x8xf32>
    %87 = arith.mulf %82, %86 : vector<8x8xf32>
    %88 = arith.truncf %87 : vector<8x8xf32> to vector<8x8xbf16>
    %89 = arith.truncf %72 : vector<8x8xf32> to vector<8x8xbf16>
    %cst_31 = arith.constant dense<0.000000e+00> : vector<8x8xf32>
    %90 = tpu.matmul %88, %89, %cst_31 {dimension_numbers = #tpu.dot_dimension_numbers<[1], [0], [0], [1], [0, 0, 1, 1], [], []>} : vector<8x8xbf16>, vector<8x8xbf16>, vector<8x8xf32> -> vector<8x8xf32>
    %91 = vector.extract_strided_slice %18 {offsets = [16, 0], sizes = [8, 32], strides = [1, 1]} : vector<32x32xbf16> to vector<8x32xbf16>
    %92 = arith.truncf %90 : vector<8x8xf32> to vector<8x8xbf16>
    %cst_32 = arith.constant dense<0.000000e+00> : vector<8x32xf32>
    %93 = tpu.matmul %92, %91, %cst_32 {dimension_numbers = #tpu.dot_dimension_numbers<[1], [0], [0], [1], [0, 0, 1, 1], [], []>} : vector<8x8xbf16>, vector<8x32xbf16>, vector<8x32xf32> -> vector<8x32xf32>
    %94 = arith.addf %69, %93 : vector<8x32xf32>
    %95 = vector.extract_strided_slice %14 {offsets = [0, 24], sizes = [8, 8], strides = [1, 1]} : vector<8x32xf32> to vector<8x8xf32>
    %96 = vector.extract_strided_slice %15 {offsets = [0, 24], sizes = [8, 8], strides = [1, 1]} : vector<8x32xf32> to vector<8x8xf32>
    %97 = vector.extract_strided_slice %16 {offsets = [0, 24], sizes = [8, 8], strides = [1, 1]} : vector<8x32xf32> to vector<8x8xf32>
    %98 = arith.truncf %95 : vector<8x8xf32> to vector<8x8xbf16>
    %99 = arith.truncf %96 : vector<8x8xf32> to vector<8x8xbf16>
    %cst_33 = arith.constant dense<0.000000e+00> : vector<8x8xf32>
    %100 = tpu.matmul %98, %99, %cst_33 {dimension_numbers = #tpu.dot_dimension_numbers<[1], [1], [0], [0], [0, 0, 1, 0], [], []>} : vector<8x8xbf16>, vector<8x8xbf16>, vector<8x8xf32> -> vector<8x8xf32>
    %cst_34 = arith.constant 0.353553385 : f32
    %101 = vector.broadcast %cst_34 : f32 to vector<8x8xf32>
    %102 = arith.mulf %100, %101 : vector<8x8xf32>
    %cst_35 = arith.constant dense<0xFF800000> : vector<8xf32>
    %103 = vector.multi_reduction <maximumf>, %102, %cst_35 [1] : vector<8x8xf32> to vector<8xf32>
    %104 = vector.shape_cast %103 : vector<8xf32> to vector<8x1xf32>
    %105 = vector.broadcast %104 : vector<8x1xf32> to vector<8x8xf32>
    %106 = arith.subf %102, %105 : vector<8x8xf32>
    %107 = math.exp %106 : vector<8x8xf32>
    %cst_36 = arith.constant dense<0.000000e+00> : vector<8xf32>
    %108 = vector.multi_reduction <add>, %107, %cst_36 [1] : vector<8x8xf32> to vector<8xf32>
    %109 = vector.shape_cast %108 : vector<8xf32> to vector<8x1xf32>
    %110 = tpu.reciprocal %109 {approx = true} : vector<8x1xf32> -> vector<8x1xf32>
    %111 = vector.broadcast %110 : vector<8x1xf32> to vector<8x8xf32>
    %112 = arith.mulf %107, %111 : vector<8x8xf32>
    %113 = arith.truncf %112 : vector<8x8xf32> to vector<8x8xbf16>
    %114 = arith.truncf %97 : vector<8x8xf32> to vector<8x8xbf16>
    %cst_37 = arith.constant dense<0.000000e+00> : vector<8x8xf32>
    %115 = tpu.matmul %113, %114, %cst_37 {dimension_numbers = #tpu.dot_dimension_numbers<[1], [0], [0], [1], [0, 0, 1, 1], [], []>} : vector<8x8xbf16>, vector<8x8xbf16>, vector<8x8xf32> -> vector<8x8xf32>
    %116 = vector.extract_strided_slice %18 {offsets = [24, 0], sizes = [8, 32], strides = [1, 1]} : vector<32x32xbf16> to vector<8x32xbf16>
    %117 = arith.truncf %115 : vector<8x8xf32> to vector<8x8xbf16>
    %cst_38 = arith.constant dense<0.000000e+00> : vector<8x32xf32>
    %118 = tpu.matmul %117, %116, %cst_38 {dimension_numbers = #tpu.dot_dimension_numbers<[1], [0], [0], [1], [0, 0, 1, 1], [], []>} : vector<8x8xbf16>, vector<8x32xbf16>, vector<8x32xf32> -> vector<8x32xf32>
    %119 = arith.addf %94, %118 : vector<8x32xf32>
    %c0_39 = arith.constant 0 : index
    %c0_40 = arith.constant 0 : index
    %c0_41 = arith.constant 0 : index
    %120 = vector.load %arg7[%c0_39, %c0_40, %c0_41] : memref<1x1x32xf32, #tpu.memory_space<vmem>>, vector<1x1x32xf32>
    %121 = vector.shape_cast %120 : vector<1x1x32xf32> to vector<1x32xf32>
    %122 = vector.broadcast %121 : vector<1x32xf32> to vector<8x32xf32>
    %123 = arith.addf %119, %122 : vector<8x32xf32>
    %124 = arith.addf %3, %123 : vector<8x32xf32>
    %cst_42 = arith.constant dense<0.000000e+00> : vector<8xf32>
    %125 = vector.multi_reduction <add>, %124, %cst_42 [1] : vector<8x32xf32> to vector<8xf32>
    %126 = vector.shape_cast %125 : vector<8xf32> to vector<8x1xf32>
    %cst_43 = arith.constant 3.200000e+01 : f32
    %127 = vector.broadcast %cst_43 : f32 to vector<8x1xf32>
    %128 = arith.divf %126, %127 : vector<8x1xf32>
    %129 = vector.broadcast %128 : vector<8x1xf32> to vector<8x32xf32>
    %130 = arith.subf %124, %129 : vector<8x32xf32>
    %131 = arith.mulf %130, %130 : vector<8x32xf32>
    %cst_44 = arith.constant dense<0.000000e+00> : vector<8xf32>
    %132 = vector.multi_reduction <add>, %131, %cst_44 [1] : vector<8x32xf32> to vector<8xf32>
    %133 = vector.shape_cast %132 : vector<8xf32> to vector<8x1xf32>
    %cst_45 = arith.constant 3.200000e+01 : f32
    %134 = vector.broadcast %cst_45 : f32 to vector<8x1xf32>
    %135 = arith.divf %133, %134 : vector<8x1xf32>
    %136 = vector.broadcast %128 : vector<8x1xf32> to vector<8x32xf32>
    %137 = arith.subf %124, %136 : vector<8x32xf32>
    %cst_46 = arith.constant 9.99999974E-6 : f32
    %138 = vector.broadcast %cst_46 : f32 to vector<8x1xf32>
    %139 = arith.addf %135, %138 : vector<8x1xf32>
    %140 = math.rsqrt %139 : vector<8x1xf32>
    %141 = vector.broadcast %140 : vector<8x1xf32> to vector<8x32xf32>
    %142 = arith.mulf %137, %141 : vector<8x32xf32>
    %c0_47 = arith.constant 0 : index
    %c0_48 = arith.constant 0 : index
    %c0_49 = arith.constant 0 : index
    %143 = vector.load %arg16[%c0_47, %c0_48, %c0_49] : memref<1x1x32xf32, #tpu.memory_space<vmem>>, vector<1x1x32xf32>
    %144 = vector.shape_cast %143 : vector<1x1x32xf32> to vector<1x32xf32>
    %145 = vector.broadcast %144 : vector<1x32xf32> to vector<8x32xf32>
    %146 = arith.mulf %142, %145 : vector<8x32xf32>
    %c0_50 = arith.constant 0 : index
    %c0_51 = arith.constant 0 : index
    %c0_52 = arith.constant 0 : index
    %147 = vector.load %arg17[%c0_50, %c0_51, %c0_52] : memref<1x1x32xf32, #tpu.memory_space<vmem>>, vector<1x1x32xf32>
    %148 = vector.shape_cast %147 : vector<1x1x32xf32> to vector<1x32xf32>
    %149 = vector.broadcast %148 : vector<1x32xf32> to vector<8x32xf32>
    %150 = arith.addf %146, %149 : vector<8x32xf32>
    %c0_53 = arith.constant 0 : index
    %c0_54 = arith.constant 0 : index
    %c0_55 = arith.constant 0 : index
    %151 = vector.load %arg8[%c0_53, %c0_54, %c0_55] : memref<1x32x96xbf16, #tpu.memory_space<vmem>>, vector<1x32x96xbf16>
    %152 = vector.shape_cast %151 : vector<1x32x96xbf16> to vector<32x96xbf16>
    %c0_56 = arith.constant 0 : index
    %c0_57 = arith.constant 0 : index
    %c0_58 = arith.constant 0 : index
    %153 = vector.load %arg9[%c0_56, %c0_57, %c0_58] : memref<1x1x96xf32, #tpu.memory_space<vmem>>, vector<1x1x96xf32>
    %154 = vector.shape_cast %153 : vector<1x1x96xf32> to vector<1x96xf32>
    %155 = vector.extract_strided_slice %152 {offsets = [0, 0], sizes = [32, 32], strides = [1, 1]} : vector<32x96xbf16> to vector<32x32xbf16>
    %156 = arith.truncf %150 : vector<8x32xf32> to vector<8x32xbf16>
    %cst_59 = arith.constant dense<0.000000e+00> : vector<8x32xf32>
    %157 = tpu.matmul %156, %155, %cst_59 {dimension_numbers = #tpu.dot_dimension_numbers<[1], [0], [0], [1], [0, 0, 1, 1], [], []>} : vector<8x32xbf16>, vector<32x32xbf16>, vector<8x32xf32> -> vector<8x32xf32>
    %158 = vector.extract_strided_slice %154 {offsets = [0, 0], sizes = [1, 32], strides = [1, 1]} : vector<1x96xf32> to vector<1x32xf32>
    %159 = vector.broadcast %158 : vector<1x32xf32> to vector<8x32xf32>
    %160 = arith.addf %157, %159 : vector<8x32xf32>
    %161 = vector.extract_strided_slice %152 {offsets = [0, 32], sizes = [32, 64], strides = [1, 1]} : vector<32x96xbf16> to vector<32x64xbf16>
    %162 = arith.truncf %5 : vector<10x32xf32> to vector<10x32xbf16>
    %cst_60 = arith.constant dense<0.000000e+00> : vector<10x64xf32>
    %163 = tpu.matmul %162, %161, %cst_60 {dimension_numbers = #tpu.dot_dimension_numbers<[1], [0], [0], [1], [0, 0, 1, 1], [], []>} : vector<10x32xbf16>, vector<32x64xbf16>, vector<10x64xf32> -> vector<10x64xf32>
    %164 = vector.extract_strided_slice %154 {offsets = [0, 32], sizes = [1, 64], strides = [1, 1]} : vector<1x96xf32> to vector<1x64xf32>
    %165 = vector.broadcast %164 : vector<1x64xf32> to vector<10x64xf32>
    %166 = arith.addf %163, %165 : vector<10x64xf32>
    %167 = vector.extract_strided_slice %166 {offsets = [0, 0], sizes = [10, 32], strides = [1, 1]} : vector<10x64xf32> to vector<10x32xf32>
    %168 = vector.extract_strided_slice %166 {offsets = [0, 32], sizes = [10, 32], strides = [1, 1]} : vector<10x64xf32> to vector<10x32xf32>
    %c0_61 = arith.constant 0 : index
    %c0_62 = arith.constant 0 : index
    %c0_63 = arith.constant 0 : index
    %169 = vector.load %arg10[%c0_61, %c0_62, %c0_63] : memref<1x32x32xbf16, #tpu.memory_space<vmem>>, vector<1x32x32xbf16>
    %170 = vector.shape_cast %169 : vector<1x32x32xbf16> to vector<32x32xbf16>
    %cst_64 = arith.constant 0.000000e+00 : f32
    %171 = vector.broadcast %cst_64 : f32 to vector<8x32xf32>
    %172 = vector.extract_strided_slice %160 {offsets = [0, 0], sizes = [8, 8], strides = [1, 1]} : vector<8x32xf32> to vector<8x8xf32>
    %173 = vector.extract_strided_slice %167 {offsets = [0, 0], sizes = [10, 8], strides = [1, 1]} : vector<10x32xf32> to vector<10x8xf32>
    %174 = vector.extract_strided_slice %168 {offsets = [0, 0], sizes = [10, 8], strides = [1, 1]} : vector<10x32xf32> to vector<10x8xf32>
    %175 = arith.truncf %172 : vector<8x8xf32> to vector<8x8xbf16>
    %176 = arith.truncf %173 : vector<10x8xf32> to vector<10x8xbf16>
    %cst_65 = arith.constant dense<0.000000e+00> : vector<8x10xf32>
    %177 = tpu.matmul %175, %176, %cst_65 {dimension_numbers = #tpu.dot_dimension_numbers<[1], [1], [0], [0], [0, 0, 1, 0], [], []>} : vector<8x8xbf16>, vector<10x8xbf16>, vector<8x10xf32> -> vector<8x10xf32>
    %cst_66 = arith.constant 0.353553385 : f32
    %178 = vector.broadcast %cst_66 : f32 to vector<8x10xf32>
    %179 = arith.mulf %177, %178 : vector<8x10xf32>
    %cst_67 = arith.constant dense<0xFF800000> : vector<8xf32>
    %180 = vector.multi_reduction <maximumf>, %179, %cst_67 [1] : vector<8x10xf32> to vector<8xf32>
    %181 = vector.shape_cast %180 : vector<8xf32> to vector<8x1xf32>
    %182 = vector.broadcast %181 : vector<8x1xf32> to vector<8x10xf32>
    %183 = arith.subf %179, %182 : vector<8x10xf32>
    %184 = math.exp %183 : vector<8x10xf32>
    %cst_68 = arith.constant dense<0.000000e+00> : vector<8xf32>
    %185 = vector.multi_reduction <add>, %184, %cst_68 [1] : vector<8x10xf32> to vector<8xf32>
    %186 = vector.shape_cast %185 : vector<8xf32> to vector<8x1xf32>
    %187 = tpu.reciprocal %186 {approx = true} : vector<8x1xf32> -> vector<8x1xf32>
    %188 = vector.broadcast %187 : vector<8x1xf32> to vector<8x10xf32>
    %189 = arith.mulf %184, %188 : vector<8x10xf32>
    %190 = arith.truncf %189 : vector<8x10xf32> to vector<8x10xbf16>
    %191 = arith.truncf %174 : vector<10x8xf32> to vector<10x8xbf16>
    %cst_69 = arith.constant dense<0.000000e+00> : vector<8x8xf32>
    %192 = tpu.matmul %190, %191, %cst_69 {dimension_numbers = #tpu.dot_dimension_numbers<[1], [0], [0], [1], [0, 0, 1, 1], [], []>} : vector<8x10xbf16>, vector<10x8xbf16>, vector<8x8xf32> -> vector<8x8xf32>
    %193 = vector.extract_strided_slice %170 {offsets = [0, 0], sizes = [8, 32], strides = [1, 1]} : vector<32x32xbf16> to vector<8x32xbf16>
    %194 = arith.truncf %192 : vector<8x8xf32> to vector<8x8xbf16>
    %cst_70 = arith.constant dense<0.000000e+00> : vector<8x32xf32>
    %195 = tpu.matmul %194, %193, %cst_70 {dimension_numbers = #tpu.dot_dimension_numbers<[1], [0], [0], [1], [0, 0, 1, 1], [], []>} : vector<8x8xbf16>, vector<8x32xbf16>, vector<8x32xf32> -> vector<8x32xf32>
    %196 = arith.addf %171, %195 : vector<8x32xf32>
    %197 = vector.extract_strided_slice %160 {offsets = [0, 8], sizes = [8, 8], strides = [1, 1]} : vector<8x32xf32> to vector<8x8xf32>
    %198 = vector.extract_strided_slice %167 {offsets = [0, 8], sizes = [10, 8], strides = [1, 1]} : vector<10x32xf32> to vector<10x8xf32>
    %199 = vector.extract_strided_slice %168 {offsets = [0, 8], sizes = [10, 8], strides = [1, 1]} : vector<10x32xf32> to vector<10x8xf32>
    %200 = arith.truncf %197 : vector<8x8xf32> to vector<8x8xbf16>
    %201 = arith.truncf %198 : vector<10x8xf32> to vector<10x8xbf16>
    %cst_71 = arith.constant dense<0.000000e+00> : vector<8x10xf32>
    %202 = tpu.matmul %200, %201, %cst_71 {dimension_numbers = #tpu.dot_dimension_numbers<[1], [1], [0], [0], [0, 0, 1, 0], [], []>} : vector<8x8xbf16>, vector<10x8xbf16>, vector<8x10xf32> -> vector<8x10xf32>
    %cst_72 = arith.constant 0.353553385 : f32
    %203 = vector.broadcast %cst_72 : f32 to vector<8x10xf32>
    %204 = arith.mulf %202, %203 : vector<8x10xf32>
    %cst_73 = arith.constant dense<0xFF800000> : vector<8xf32>
    %205 = vector.multi_reduction <maximumf>, %204, %cst_73 [1] : vector<8x10xf32> to vector<8xf32>
    %206 = vector.shape_cast %205 : vector<8xf32> to vector<8x1xf32>
    %207 = vector.broadcast %206 : vector<8x1xf32> to vector<8x10xf32>
    %208 = arith.subf %204, %207 : vector<8x10xf32>
    %209 = math.exp %208 : vector<8x10xf32>
    %cst_74 = arith.constant dense<0.000000e+00> : vector<8xf32>
    %210 = vector.multi_reduction <add>, %209, %cst_74 [1] : vector<8x10xf32> to vector<8xf32>
    %211 = vector.shape_cast %210 : vector<8xf32> to vector<8x1xf32>
    %212 = tpu.reciprocal %211 {approx = true} : vector<8x1xf32> -> vector<8x1xf32>
    %213 = vector.broadcast %212 : vector<8x1xf32> to vector<8x10xf32>
    %214 = arith.mulf %209, %213 : vector<8x10xf32>
    %215 = arith.truncf %214 : vector<8x10xf32> to vector<8x10xbf16>
    %216 = arith.truncf %199 : vector<10x8xf32> to vector<10x8xbf16>
    %cst_75 = arith.constant dense<0.000000e+00> : vector<8x8xf32>
    %217 = tpu.matmul %215, %216, %cst_75 {dimension_numbers = #tpu.dot_dimension_numbers<[1], [0], [0], [1], [0, 0, 1, 1], [], []>} : vector<8x10xbf16>, vector<10x8xbf16>, vector<8x8xf32> -> vector<8x8xf32>
    %218 = vector.extract_strided_slice %170 {offsets = [8, 0], sizes = [8, 32], strides = [1, 1]} : vector<32x32xbf16> to vector<8x32xbf16>
    %219 = arith.truncf %217 : vector<8x8xf32> to vector<8x8xbf16>
    %cst_76 = arith.constant dense<0.000000e+00> : vector<8x32xf32>
    %220 = tpu.matmul %219, %218, %cst_76 {dimension_numbers = #tpu.dot_dimension_numbers<[1], [0], [0], [1], [0, 0, 1, 1], [], []>} : vector<8x8xbf16>, vector<8x32xbf16>, vector<8x32xf32> -> vector<8x32xf32>
    %221 = arith.addf %196, %220 : vector<8x32xf32>
    %222 = vector.extract_strided_slice %160 {offsets = [0, 16], sizes = [8, 8], strides = [1, 1]} : vector<8x32xf32> to vector<8x8xf32>
    %223 = vector.extract_strided_slice %167 {offsets = [0, 16], sizes = [10, 8], strides = [1, 1]} : vector<10x32xf32> to vector<10x8xf32>
    %224 = vector.extract_strided_slice %168 {offsets = [0, 16], sizes = [10, 8], strides = [1, 1]} : vector<10x32xf32> to vector<10x8xf32>
    %225 = arith.truncf %222 : vector<8x8xf32> to vector<8x8xbf16>
    %226 = arith.truncf %223 : vector<10x8xf32> to vector<10x8xbf16>
    %cst_77 = arith.constant dense<0.000000e+00> : vector<8x10xf32>
    %227 = tpu.matmul %225, %226, %cst_77 {dimension_numbers = #tpu.dot_dimension_numbers<[1], [1], [0], [0], [0, 0, 1, 0], [], []>} : vector<8x8xbf16>, vector<10x8xbf16>, vector<8x10xf32> -> vector<8x10xf32>
    %cst_78 = arith.constant 0.353553385 : f32
    %228 = vector.broadcast %cst_78 : f32 to vector<8x10xf32>
    %229 = arith.mulf %227, %228 : vector<8x10xf32>
    %cst_79 = arith.constant dense<0xFF800000> : vector<8xf32>
    %230 = vector.multi_reduction <maximumf>, %229, %cst_79 [1] : vector<8x10xf32> to vector<8xf32>
    %231 = vector.shape_cast %230 : vector<8xf32> to vector<8x1xf32>
    %232 = vector.broadcast %231 : vector<8x1xf32> to vector<8x10xf32>
    %233 = arith.subf %229, %232 : vector<8x10xf32>
    %234 = math.exp %233 : vector<8x10xf32>
    %cst_80 = arith.constant dense<0.000000e+00> : vector<8xf32>
    %235 = vector.multi_reduction <add>, %234, %cst_80 [1] : vector<8x10xf32> to vector<8xf32>
    %236 = vector.shape_cast %235 : vector<8xf32> to vector<8x1xf32>
    %237 = tpu.reciprocal %236 {approx = true} : vector<8x1xf32> -> vector<8x1xf32>
    %238 = vector.broadcast %237 : vector<8x1xf32> to vector<8x10xf32>
    %239 = arith.mulf %234, %238 : vector<8x10xf32>
    %240 = arith.truncf %239 : vector<8x10xf32> to vector<8x10xbf16>
    %241 = arith.truncf %224 : vector<10x8xf32> to vector<10x8xbf16>
    %cst_81 = arith.constant dense<0.000000e+00> : vector<8x8xf32>
    %242 = tpu.matmul %240, %241, %cst_81 {dimension_numbers = #tpu.dot_dimension_numbers<[1], [0], [0], [1], [0, 0, 1, 1], [], []>} : vector<8x10xbf16>, vector<10x8xbf16>, vector<8x8xf32> -> vector<8x8xf32>
    %243 = vector.extract_strided_slice %170 {offsets = [16, 0], sizes = [8, 32], strides = [1, 1]} : vector<32x32xbf16> to vector<8x32xbf16>
    %244 = arith.truncf %242 : vector<8x8xf32> to vector<8x8xbf16>
    %cst_82 = arith.constant dense<0.000000e+00> : vector<8x32xf32>
    %245 = tpu.matmul %244, %243, %cst_82 {dimension_numbers = #tpu.dot_dimension_numbers<[1], [0], [0], [1], [0, 0, 1, 1], [], []>} : vector<8x8xbf16>, vector<8x32xbf16>, vector<8x32xf32> -> vector<8x32xf32>
    %246 = arith.addf %221, %245 : vector<8x32xf32>
    %247 = vector.extract_strided_slice %160 {offsets = [0, 24], sizes = [8, 8], strides = [1, 1]} : vector<8x32xf32> to vector<8x8xf32>
    %248 = vector.extract_strided_slice %167 {offsets = [0, 24], sizes = [10, 8], strides = [1, 1]} : vector<10x32xf32> to vector<10x8xf32>
    %249 = vector.extract_strided_slice %168 {offsets = [0, 24], sizes = [10, 8], strides = [1, 1]} : vector<10x32xf32> to vector<10x8xf32>
    %250 = arith.truncf %247 : vector<8x8xf32> to vector<8x8xbf16>
    %251 = arith.truncf %248 : vector<10x8xf32> to vector<10x8xbf16>
    %cst_83 = arith.constant dense<0.000000e+00> : vector<8x10xf32>
    %252 = tpu.matmul %250, %251, %cst_83 {dimension_numbers = #tpu.dot_dimension_numbers<[1], [1], [0], [0], [0, 0, 1, 0], [], []>} : vector<8x8xbf16>, vector<10x8xbf16>, vector<8x10xf32> -> vector<8x10xf32>
    %cst_84 = arith.constant 0.353553385 : f32
    %253 = vector.broadcast %cst_84 : f32 to vector<8x10xf32>
    %254 = arith.mulf %252, %253 : vector<8x10xf32>
    %cst_85 = arith.constant dense<0xFF800000> : vector<8xf32>
    %255 = vector.multi_reduction <maximumf>, %254, %cst_85 [1] : vector<8x10xf32> to vector<8xf32>
    %256 = vector.shape_cast %255 : vector<8xf32> to vector<8x1xf32>
    %257 = vector.broadcast %256 : vector<8x1xf32> to vector<8x10xf32>
    %258 = arith.subf %254, %257 : vector<8x10xf32>
    %259 = math.exp %258 : vector<8x10xf32>
    %cst_86 = arith.constant dense<0.000000e+00> : vector<8xf32>
    %260 = vector.multi_reduction <add>, %259, %cst_86 [1] : vector<8x10xf32> to vector<8xf32>
    %261 = vector.shape_cast %260 : vector<8xf32> to vector<8x1xf32>
    %262 = tpu.reciprocal %261 {approx = true} : vector<8x1xf32> -> vector<8x1xf32>
    %263 = vector.broadcast %262 : vector<8x1xf32> to vector<8x10xf32>
    %264 = arith.mulf %259, %263 : vector<8x10xf32>
    %265 = arith.truncf %264 : vector<8x10xf32> to vector<8x10xbf16>
    %266 = arith.truncf %249 : vector<10x8xf32> to vector<10x8xbf16>
    %cst_87 = arith.constant dense<0.000000e+00> : vector<8x8xf32>
    %267 = tpu.matmul %265, %266, %cst_87 {dimension_numbers = #tpu.dot_dimension_numbers<[1], [0], [0], [1], [0, 0, 1, 1], [], []>} : vector<8x10xbf16>, vector<10x8xbf16>, vector<8x8xf32> -> vector<8x8xf32>
    %268 = vector.extract_strided_slice %170 {offsets = [24, 0], sizes = [8, 32], strides = [1, 1]} : vector<32x32xbf16> to vector<8x32xbf16>
    %269 = arith.truncf %267 : vector<8x8xf32> to vector<8x8xbf16>
    %cst_88 = arith.constant dense<0.000000e+00> : vector<8x32xf32>
    %270 = tpu.matmul %269, %268, %cst_88 {dimension_numbers = #tpu.dot_dimension_numbers<[1], [0], [0], [1], [0, 0, 1, 1], [], []>} : vector<8x8xbf16>, vector<8x32xbf16>, vector<8x32xf32> -> vector<8x32xf32>
    %271 = arith.addf %246, %270 : vector<8x32xf32>
    %c0_89 = arith.constant 0 : index
    %c0_90 = arith.constant 0 : index
    %c0_91 = arith.constant 0 : index
    %272 = vector.load %arg11[%c0_89, %c0_90, %c0_91] : memref<1x1x32xf32, #tpu.memory_space<vmem>>, vector<1x1x32xf32>
    %273 = vector.shape_cast %272 : vector<1x1x32xf32> to vector<1x32xf32>
    %274 = vector.broadcast %273 : vector<1x32xf32> to vector<8x32xf32>
    %275 = arith.addf %271, %274 : vector<8x32xf32>
    %276 = arith.addf %150, %275 : vector<8x32xf32>
    %cst_92 = arith.constant dense<0.000000e+00> : vector<8xf32>
    %277 = vector.multi_reduction <add>, %276, %cst_92 [1] : vector<8x32xf32> to vector<8xf32>
    %278 = vector.shape_cast %277 : vector<8xf32> to vector<8x1xf32>
    %cst_93 = arith.constant 3.200000e+01 : f32
    %279 = vector.broadcast %cst_93 : f32 to vector<8x1xf32>
    %280 = arith.divf %278, %279 : vector<8x1xf32>
    %281 = vector.broadcast %280 : vector<8x1xf32> to vector<8x32xf32>
    %282 = arith.subf %276, %281 : vector<8x32xf32>
    %283 = arith.mulf %282, %282 : vector<8x32xf32>
    %cst_94 = arith.constant dense<0.000000e+00> : vector<8xf32>
    %284 = vector.multi_reduction <add>, %283, %cst_94 [1] : vector<8x32xf32> to vector<8xf32>
    %285 = vector.shape_cast %284 : vector<8xf32> to vector<8x1xf32>
    %cst_95 = arith.constant 3.200000e+01 : f32
    %286 = vector.broadcast %cst_95 : f32 to vector<8x1xf32>
    %287 = arith.divf %285, %286 : vector<8x1xf32>
    %288 = vector.broadcast %280 : vector<8x1xf32> to vector<8x32xf32>
    %289 = arith.subf %276, %288 : vector<8x32xf32>
    %cst_96 = arith.constant 9.99999974E-6 : f32
    %290 = vector.broadcast %cst_96 : f32 to vector<8x1xf32>
    %291 = arith.addf %287, %290 : vector<8x1xf32>
    %292 = math.rsqrt %291 : vector<8x1xf32>
    %293 = vector.broadcast %292 : vector<8x1xf32> to vector<8x32xf32>
    %294 = arith.mulf %289, %293 : vector<8x32xf32>
    %c0_97 = arith.constant 0 : index
    %c0_98 = arith.constant 0 : index
    %c0_99 = arith.constant 0 : index
    %295 = vector.load %arg18[%c0_97, %c0_98, %c0_99] : memref<1x1x32xf32, #tpu.memory_space<vmem>>, vector<1x1x32xf32>
    %296 = vector.shape_cast %295 : vector<1x1x32xf32> to vector<1x32xf32>
    %297 = vector.broadcast %296 : vector<1x32xf32> to vector<8x32xf32>
    %298 = arith.mulf %294, %297 : vector<8x32xf32>
    %c0_100 = arith.constant 0 : index
    %c0_101 = arith.constant 0 : index
    %c0_102 = arith.constant 0 : index
    %299 = vector.load %arg19[%c0_100, %c0_101, %c0_102] : memref<1x1x32xf32, #tpu.memory_space<vmem>>, vector<1x1x32xf32>
    %300 = vector.shape_cast %299 : vector<1x1x32xf32> to vector<1x32xf32>
    %301 = vector.broadcast %300 : vector<1x32xf32> to vector<8x32xf32>
    %302 = arith.addf %298, %301 : vector<8x32xf32>
    %c0_103 = arith.constant 0 : index
    %c0_104 = arith.constant 0 : index
    %c0_105 = arith.constant 0 : index
    %303 = vector.load %arg12[%c0_103, %c0_104, %c0_105] : memref<1x32x64xbf16, #tpu.memory_space<vmem>>, vector<1x32x64xbf16>
    %304 = vector.shape_cast %303 : vector<1x32x64xbf16> to vector<32x64xbf16>
    %305 = arith.truncf %302 : vector<8x32xf32> to vector<8x32xbf16>
    %cst_106 = arith.constant dense<0.000000e+00> : vector<8x64xf32>
    %306 = tpu.matmul %305, %304, %cst_106 {dimension_numbers = #tpu.dot_dimension_numbers<[1], [0], [0], [1], [0, 0, 1, 1], [], []>} : vector<8x32xbf16>, vector<32x64xbf16>, vector<8x64xf32> -> vector<8x64xf32>
    %c0_107 = arith.constant 0 : index
    %c0_108 = arith.constant 0 : index
    %c0_109 = arith.constant 0 : index
    %307 = vector.load %arg13[%c0_107, %c0_108, %c0_109] : memref<1x1x64xf32, #tpu.memory_space<vmem>>, vector<1x1x64xf32>
    %308 = vector.shape_cast %307 : vector<1x1x64xf32> to vector<1x64xf32>
    %309 = vector.broadcast %308 : vector<1x64xf32> to vector<8x64xf32>
    %310 = arith.addf %306, %309 : vector<8x64xf32>
    %cst_110 = arith.constant 0.000000e+00 : f32
    %311 = vector.broadcast %cst_110 : f32 to vector<8x64xf32>
    %312 = arith.maximumf %310, %311 : vector<8x64xf32>
    %c0_111 = arith.constant 0 : index
    %c0_112 = arith.constant 0 : index
    %c0_113 = arith.constant 0 : index
    %313 = vector.load %arg14[%c0_111, %c0_112, %c0_113] : memref<1x64x32xbf16, #tpu.memory_space<vmem>>, vector<1x64x32xbf16>
    %314 = vector.shape_cast %313 : vector<1x64x32xbf16> to vector<64x32xbf16>
    %315 = arith.truncf %312 : vector<8x64xf32> to vector<8x64xbf16>
    %cst_114 = arith.constant dense<0.000000e+00> : vector<8x32xf32>
    %316 = tpu.matmul %315, %314, %cst_114 {dimension_numbers = #tpu.dot_dimension_numbers<[1], [0], [0], [1], [0, 0, 1, 1], [], []>} : vector<8x64xbf16>, vector<64x32xbf16>, vector<8x32xf32> -> vector<8x32xf32>
    %c0_115 = arith.constant 0 : index
    %c0_116 = arith.constant 0 : index
    %c0_117 = arith.constant 0 : index
    %317 = vector.load %arg15[%c0_115, %c0_116, %c0_117] : memref<1x1x32xf32, #tpu.memory_space<vmem>>, vector<1x1x32xf32>
    %318 = vector.shape_cast %317 : vector<1x1x32xf32> to vector<1x32xf32>
    %319 = vector.broadcast %318 : vector<1x32xf32> to vector<8x32xf32>
    %320 = arith.addf %316, %319 : vector<8x32xf32>
    %321 = arith.addf %302, %320 : vector<8x32xf32>
    %cst_118 = arith.constant dense<0.000000e+00> : vector<8xf32>
    %322 = vector.multi_reduction <add>, %321, %cst_118 [1] : vector<8x32xf32> to vector<8xf32>
    %323 = vector.shape_cast %322 : vector<8xf32> to vector<8x1xf32>
    %cst_119 = arith.constant 3.200000e+01 : f32
    %324 = vector.broadcast %cst_119 : f32 to vector<8x1xf32>
    %325 = arith.divf %323, %324 : vector<8x1xf32>
    %326 = vector.broadcast %325 : vector<8x1xf32> to vector<8x32xf32>
    %327 = arith.subf %321, %326 : vector<8x32xf32>
    %328 = arith.mulf %327, %327 : vector<8x32xf32>
    %cst_120 = arith.constant dense<0.000000e+00> : vector<8xf32>
    %329 = vector.multi_reduction <add>, %328, %cst_120 [1] : vector<8x32xf32> to vector<8xf32>
    %330 = vector.shape_cast %329 : vector<8xf32> to vector<8x1xf32>
    %cst_121 = arith.constant 3.200000e+01 : f32
    %331 = vector.broadcast %cst_121 : f32 to vector<8x1xf32>
    %332 = arith.divf %330, %331 : vector<8x1xf32>
    %333 = vector.broadcast %325 : vector<8x1xf32> to vector<8x32xf32>
    %334 = arith.subf %321, %333 : vector<8x32xf32>
    %cst_122 = arith.constant 9.99999974E-6 : f32
    %335 = vector.broadcast %cst_122 : f32 to vector<8x1xf32>
    %336 = arith.addf %332, %335 : vector<8x1xf32>
    %337 = math.rsqrt %336 : vector<8x1xf32>
    %338 = vector.broadcast %337 : vector<8x1xf32> to vector<8x32xf32>
    %339 = arith.mulf %334, %338 : vector<8x32xf32>
    %c0_123 = arith.constant 0 : index
    %c0_124 = arith.constant 0 : index
    %c0_125 = arith.constant 0 : index
    %340 = vector.load %arg20[%c0_123, %c0_124, %c0_125] : memref<1x1x32xf32, #tpu.memory_space<vmem>>, vector<1x1x32xf32>
    %341 = vector.shape_cast %340 : vector<1x1x32xf32> to vector<1x32xf32>
    %342 = vector.broadcast %341 : vector<1x32xf32> to vector<8x32xf32>
    %343 = arith.mulf %339, %342 : vector<8x32xf32>
    %c0_126 = arith.constant 0 : index
    %c0_127 = arith.constant 0 : index
    %c0_128 = arith.constant 0 : index
    %344 = vector.load %arg21[%c0_126, %c0_127, %c0_128] : memref<1x1x32xf32, #tpu.memory_space<vmem>>, vector<1x1x32xf32>
    %345 = vector.shape_cast %344 : vector<1x1x32xf32> to vector<1x32xf32>
    %346 = vector.broadcast %345 : vector<1x32xf32> to vector<8x32xf32>
    %347 = arith.addf %343, %346 : vector<8x32xf32>
    %c0_129 = arith.constant 0 : index
    %c0_130 = arith.constant 0 : index
    %348 = vector.load %arg23[%c0_129, %c0_130] : memref<8x32xf32, #tpu.memory_space<vmem>>, vector<8x32xf32>
    tpu.vector_store %arg23[%c0_129, %c0_130], %347 {strides = array<i32>} : memref<8x32xf32, #tpu.memory_space<vmem>>, vector<8x32xf32>,
    %c0_131 = arith.constant 0 : index
    %c0_132 = arith.constant 0 : index
    %c0_133 = arith.constant 0 : index
    %349 = vector.load %arg22[%c0_131, %c0_132, %c0_133] : memref<1x8x32xf32, #tpu.memory_space<vmem>>, vector<1x8x32xf32>
    %350 = vector.shape_cast %349 : vector<1x8x32xf32> to vector<8x32xf32>
    %351 = vector.shape_cast %347 : vector<8x32xf32> to vector<1x8x32xf32>
    tpu.vector_store %arg22[%c0_131, %c0_132, %c0_133], %351 {strides = array<i32>} : memref<1x8x32xf32, #tpu.memory_space<vmem>>, vector<1x8x32xf32>,
    return
  }
  func.func @transform_0(%arg0: i32, %arg1: i32) -> (i32, i32, i32) {
    %c0_i32 = arith.constant 0 : i32
    %c0_i32_0 = arith.constant 0 : i32
    %c0_i32_1 = arith.constant 0 : i32
    return %arg0, %c0_i32, %c0_i32_0 : i32, i32, i32
  }
  func.func @transform_1(%arg0: i32, %arg1: i32) -> (i32, i32, i32) {
    %c0_i32 = arith.constant 0 : i32
    %c0_i32_0 = arith.constant 0 : i32
    %c0_i32_1 = arith.constant 0 : i32
    return %arg0, %c0_i32, %c0_i32_0 : i32, i32, i32
  }
  func.func @transform_2(%arg0: i32, %arg1: i32) -> (i32, i32, i32) {
    %c0_i32 = arith.constant 0 : i32
    %c0_i32_0 = arith.constant 0 : i32
    %c0_i32_1 = arith.constant 0 : i32
    return %arg1, %c0_i32, %c0_i32_0 : i32, i32, i32
  }
  func.func @transform_3(%arg0: i32, %arg1: i32) -> (i32, i32, i32) {
    %c0_i32 = arith.constant 0 : i32
    %c0_i32_0 = arith.constant 0 : i32
    %c0_i32_1 = arith.constant 0 : i32
    return %arg1, %c0_i32, %c0_i32_0 : i32, i32, i32
  }
  func.func @transform_4(%arg0: i32, %arg1: i32) -> (i32, i32, i32) {
    %c0_i32 = arith.constant 0 : i32
    %c0_i32_0 = arith.constant 0 : i32
    %c0_i32_1 = arith.constant 0 : i32
    return %arg1, %c0_i32, %c0_i32_0 : i32, i32, i32
  }
  func.func @transform_5(%arg0: i32, %arg1: i32) -> (i32, i32, i32) {
    %c0_i32 = arith.constant 0 : i32
    %c0_i32_0 = arith.constant 0 : i32
    %c0_i32_1 = arith.constant 0 : i32
    return %arg1, %c0_i32, %c0_i32_0 : i32, i32, i32
  }
  func.func @transform_6(%arg0: i32, %arg1: i32) -> (i32, i32, i32) {
    %c0_i32 = arith.constant 0 : i32
    %c0_i32_0 = arith.constant 0 : i32
    %c0_i32_1 = arith.constant 0 : i32
    return %arg1, %c0_i32, %c0_i32_0 : i32, i32, i32
  }
  func.func @transform_7(%arg0: i32, %arg1: i32) -> (i32, i32, i32) {
    %c0_i32 = arith.constant 0 : i32
    %c0_i32_0 = arith.constant 0 : i32
    %c0_i32_1 = arith.constant 0 : i32
    return %arg1, %c0_i32, %c0_i32_0 : i32, i32, i32
  }
  func.func @transform_8(%arg0: i32, %arg1: i32) -> (i32, i32, i32) {
    %c0_i32 = arith.constant 0 : i32
    %c0_i32_0 = arith.constant 0 : i32
    %c0_i32_1 = arith.constant 0 : i32
    return %arg1, %c0_i32, %c0_i32_0 : i32, i32, i32
  }
  func.func @transform_9(%arg0: i32, %arg1: i32) -> (i32, i32, i32) {
    %c0_i32 = arith.constant 0 : i32
    %c0_i32_0 = arith.constant 0 : i32
    %c0_i32_1 = arith.constant 0 : i32
    return %arg1, %c0_i32, %c0_i32_0 : i32, i32, i32
  }
  func.func @transform_10(%arg0: i32, %arg1: i32) -> (i32, i32, i32) {
    %c0_i32 = arith.constant 0 : i32
    %c0_i32_0 = arith.constant 0 : i32
    %c0_i32_1 = arith.constant 0 : i32
    return %arg1, %c0_i32, %c0_i32_0 : i32, i32, i32
  }
  func.func @transform_11(%arg0: i32, %arg1: i32) -> (i32, i32, i32) {
    %c0_i32 = arith.constant 0 : i32
    %c0_i32_0 = arith.constant 0 : i32
    %c0_i32_1 = arith.constant 0 : i32
    return %arg1, %c0_i32, %c0_i32_0 : i32, i32, i32
  }
  func.func @transform_12(%arg0: i32, %arg1: i32) -> (i32, i32, i32) {
    %c0_i32 = arith.constant 0 : i32
    %c0_i32_0 = arith.constant 0 : i32
    %c0_i32_1 = arith.constant 0 : i32
    return %arg1, %c0_i32, %c0_i32_0 : i32, i32, i32
  }
  func.func @transform_13(%arg0: i32, %arg1: i32) -> (i32, i32, i32) {
    %c0_i32 = arith.constant 0 : i32
    %c0_i32_0 = arith.constant 0 : i32
    %c0_i32_1 = arith.constant 0 : i32
    return %arg1, %c0_i32, %c0_i32_0 : i32, i32, i32
  }
  func.func @transform_14(%arg0: i32, %arg1: i32) -> (i32, i32, i32) {
    %c0_i32 = arith.constant 0 : i32
    %c0_i32_0 = arith.constant 0 : i32
    %c0_i32_1 = arith.constant 0 : i32
    return %arg1, %c0_i32, %c0_i32_0 : i32, i32, i32
  }
  func.func @transform_15(%arg0: i32, %arg1: i32) -> (i32, i32, i32) {
    %c0_i32 = arith.constant 0 : i32
    %c0_i32_0 = arith.constant 0 : i32
    %c0_i32_1 = arith.constant 0 : i32
    return %arg1, %c0_i32, %c0_i32_0 : i32, i32, i32
  }
  func.func @transform_16(%arg0: i32, %arg1: i32) -> (i32, i32, i32) {
    %c0_i32 = arith.constant 0 : i32
    %c0_i32_0 = arith.constant 0 : i32
    %c0_i32_1 = arith.constant 0 : i32
    return %arg1, %c0_i32, %c0_i32_0 : i32, i32, i32
  }
  func.func @transform_17(%arg0: i32, %arg1: i32) -> (i32, i32, i32) {
    %c0_i32 = arith.constant 0 : i32
    %c0_i32_0 = arith.constant 0 : i32
    %c0_i32_1 = arith.constant 0 : i32
    return %arg1, %c0_i32, %c0_i32_0 : i32, i32, i32
  }
  func.func @transform_18(%arg0: i32, %arg1: i32) -> (i32, i32, i32) {
    %c0_i32 = arith.constant 0 : i32
    %c0_i32_0 = arith.constant 0 : i32
    %c0_i32_1 = arith.constant 0 : i32
    return %arg1, %c0_i32, %c0_i32_0 : i32, i32, i32
  }
  func.func @transform_19(%arg0: i32, %arg1: i32) -> (i32, i32, i32) {
    %c0_i32 = arith.constant 0 : i32
    %c0_i32_0 = arith.constant 0 : i32
    %c0_i32_1 = arith.constant 0 : i32
    return %arg1, %c0_i32, %c0_i32_0 : i32, i32, i32
  }
  func.func @transform_20(%arg0: i32, %arg1: i32) -> (i32, i32, i32) {
    %c0_i32 = arith.constant 0 : i32
    %c0_i32_0 = arith.constant 0 : i32
    %c0_i32_1 = arith.constant 0 : i32
    return %arg0, %c0_i32, %c0_i32_0 : i32, i32, i32
  }
}

</mosaic_0001>

<bundles_post_ra>
// kernel: transformer_decoder.1
= control target key start
LH: loop header
LB: loop body
LE: loop exit
PB: predicated region body
PF: predicated region fallthrough
CT: control target
= control target key end

     0   :  { %s4734_s0 = inlined_call_operand.vmem [shape: f32[2,8,32], index: 0, kind: input, shape index: {}]   ;;  %s4735_s1 = inlined_call_operand.vmem [shape: f32[2,10,32], index: 1, kind: input, shape index: {}]   ;;  %s4736_s2 = inlined_call_operand.vmem [shape: bf16[2,32,96], index: 2, kind: input, shape index: {}]   ;;  %s4737_s3 = inlined_call_operand.vmem [shape: f32[2,1,96], index: 3, kind: input, shape index: {}]   ;;  %s4738_s4 = inlined_call_operand.vmem [shape: bf16[2,32,32], index: 4, kind: input, shape index: {}]   ;;  %s4739_s5 = inlined_call_operand.vmem [shape: f32[2,1,32], index: 5, kind: input, shape index: {}]   ;;  %s4740_s6 = inlined_call_operand.vmem [shape: bf16[2,32,96], index: 6, kind: input, shape index: {}]   ;;  %s4741_s7 = inlined_call_operand.hbm [shape: f32[2,1,96], index: 7, kind: input, shape index: {}]   ;;  %s4742_s8 = inlined_call_operand.vmem [shape: bf16[2,32,32], index: 8, kind: input, shape index: {}]   ;;  %s4743_s9 = inlined_call_operand.hbm [shape: f32[2,1,32], index: 9, kind: input, shape index: {}]   ;;  %s4744_s10 = inlined_call_operand.vmem [shape: bf16[2,32,64], index: 10, kind: input, shape index: {}]   ;;  %s4745_s11 = inlined_call_operand.hbm [shape: f32[2,1,64], index: 11, kind: input, shape index: {}]   ;;  %s4746_s12 = inlined_call_operand.vmem [shape: bf16[2,64,32], index: 12, kind: input, shape index: {}]   ;;  %s4747_s13 = inlined_call_operand.hbm [shape: f32[2,1,32], index: 13, kind: input, shape index: {}]   ;;  %s4748_s14 = inlined_call_operand.hbm [shape: f32[2,1,32], index: 14, kind: input, shape index: {}]   ;;  %s4749_s15 = inlined_call_operand.hbm [shape: f32[2,1,32], index: 15, kind: input, shape index: {}]   ;;  %s4750_s16 = inlined_call_operand.vmem [shape: f32[2,1,32], index: 16, kind: input, shape index: {}]   ;;  %s4751_s17 = inlined_call_operand.hbm [shape: f32[2,1,32], index: 17, kind: input, shape index: {}]   ;;  %s4752_s18 = inlined_call_operand.vmem [shape: f32[2,1,32], index: 18, kind: input, shape index: {}]   ;;  %s4753_s19 = inlined_call_operand.hbm [shape: f32[2,1,32], index: 19, kind: input, shape index: {}]   ;;  %s4754_s20 = inlined_call_operand.vmem [shape: f32[2,8,32], index: 20, kind: output, shape index: {}]  }
   0x1   :  { %4764 = sst [smem:[#allocation29_spill]] %s4734_s0 }
   0x2   :  { %4765 = sst [smem:[#allocation30_spill]] %s4735_s1 }
   0x3   :  { %4766 = sst [smem:[#allocation31_spill]] %s4736_s2 }
   0x4   :  { %4767 = sst [smem:[#allocation32_spill]] %s4737_s3 }
   0x5   :  { %4768 = sst [smem:[#allocation33_spill]] %s4738_s4 }
   0x6   :  { %4769 = sst [smem:[#allocation34_spill]] %s4739_s5 }
   0x7   :  { %4770 = sst [smem:[#allocation35_spill]] %s4740_s6 }
   0x8   :  { %4771 = sst [smem:[#allocation36_spill]] %s4741_s7 }
   0x9   :  { %4772 = sst [smem:[#allocation37_spill]] %s4742_s8 }
   0xa   :  { %4773 = sst [smem:[#allocation38_spill]] %s4743_s9 }
   0xb   :  { %4774 = sst [smem:[#allocation39_spill]] %s4744_s10 }
   0xc   :  { %4775 = sst [smem:[#allocation40_spill]] %s4745_s11 }
   0xd   :  { %4776 = sst [smem:[#allocation41_spill]] %s4746_s12 }
   0xe   :  { %4777 = sst [smem:[#allocation42_spill]] %s4747_s13 }
   0xf   :  { %4778 = sst [smem:[#allocation43_spill]] %s4748_s14 }
  0x10   :  { %4779 = sst [smem:[#allocation44_spill]] %s4749_s15 }
  0x11   :  { %4780 = sst [smem:[#allocation45_spill]] %s4750_s16 }
  0x12   :  { %4781 = sst [smem:[#allocation46_spill]] %s4751_s17 }
  0x13   :  { %4782 = sst [smem:[#allocation47_spill]] %s4752_s18 }
  0x14   :  { %4783 = sst [smem:[#allocation48_spill]] %s4753_s19 }
  0x15   :  { %4784 = sst [smem:[#allocation49_spill]] %s4754_s20 }
  0x16   :  { %25 = vsyncpa [#allocation4], 0 }
  0x17   :  { %27 = vsyncpa [#allocation4 + $0x1], 0 }
  0x18   :  { %28 = vsyncpa [#allocation6], 0 }
  0x19   :  { %30 = vsyncpa [#allocation6 + $0x1], 0 }
  0x1a   :  { %31 = vsyncpa [#allocation9], 0 }
  0x1b   :  { %33 = vsyncpa [#allocation9 + $0x1], 0 }
  0x1c   :  { %34 = vsyncpa [#allocation12], 0 }
  0x1d   :  { %36 = vsyncpa [#allocation12 + $0x1], 0 }
  0x1e   :  { %37 = vsyncpa [#allocation15], 0 }
  0x1f   :  { %39 = vsyncpa [#allocation15 + $0x1], 0  ;;  %s4117_s1 = smov 0   ;;  %s4119_s22 = smov 0  }
  0x20   :  { %s4121_s23 = smov 0   ;;  %s4123_s24 = smov 0  }
  0x21   :  { %s4125_s2 = smov 0   ;;  %s4127_s25 = smov 0  }
  0x22   :  { %s4129_s3 = smov 0   ;;  %s4131_s26 = smov 0  }
  0x23 LB: > { %4785 = sst [smem:[#allocation21_spill]] %s3965_s22  ;;  %s4757_s27 = sadd.s32 4294967295, %s3989_s26   ;;  %s3989_s26 = sphi %s4131_s26, %s45_s26   ;;  %s3985_s3 = sphi %s4129_s3, %s4842_s3   ;;  %s3981_s25 = sphi %s4127_s25, %s4841_s25   ;;  %s3977_s2 = sphi %s4125_s2, %s4840_s2   ;;  %s3973_s24 = sphi %s4123_s24, %s4839_s24   ;;  %s3969_s23 = sphi %s4121_s23, %s4838_s23   ;;  %s3965_s22 = sphi %s4119_s22, %s4837_s22   ;;  %s3961_s1 = sphi %s4117_s1, %s4836_s1  }
  0x24   : > { %4786 = sst [smem:[#allocation22_spill]] %s3969_s23  ;;  %s54_s28 = sadd.s32 1, %s3981_s25 }
  0x25   : > { %4787 = sst [smem:[#allocation23_spill]] %s3981_s25  ;;  %p55_p0 = scmp.ge.s32.totalorder %s54_s28, 2 }
  0x26   : > { %4788 = sst [smem:[#allocation24_spill]] %s3985_s3  ;;  %s57_s4 = sadd.s32 1, %s3985_s3 }
  0x27   : > { %4789 = sst [smem:[#allocation25_spill]] %s3989_s26  ;;  %s246_s29 = sadd.s32 1, %s3969_s23 }
  0x28   : > { %p253_p1 = scmp.ne.s32.totalorder %s3969_s23, %s3965_s22  ;;  %s4844_s28 = smov (%p55_p0, %s54_s28), 0 }
  0x29   : > { %4790 = sst [smem:[#allocation26_spill]] %s4844_s28  ;;  %s4846_s4 = smov (!%p55_p0, %s57_s4), %s3985_s3 }
  0x2a   : > { %s243_s30 = ssub.s32 %s3981_s25, %s4844_s28  ;;  %p254_p2 = scmp.eq.s32.totalorder %s3989_s26, 0 }
  0x2b   : > { %p59_p3 = scmp.ge.s32.totalorder %s4846_s4, 2  ;;  %p244_p4 = scmp.eq.s32.totalorder %s243_s30, 0 }
  0x2c   : > { %p255_p5 = por %p254_p2, %p253_p1  ;;  %p259_p6 = scmp.ne.s32.totalorder %s3965_s22, %s3961_s1 }
  0x2d   : > { %s4848_s4 = smov (%p59_p3, %s4846_s4), 0  ;;  %p260_p7 = scmp.eq.s32.totalorder %s4757_s27, 0 }
  0x2e   : > { %4791 = sst [smem:[#allocation27_spill]] %s4848_s4  ;;  %p3557_p8 = scmp.lt.s32.totalorder %s3989_s26, 4 }
  0x2f   : > { %s4171_s0 = scalar_select %p244_p4, %s3969_s23, %s246_s29  }
  0x30   : > { %s4177_s21 = sand.u32 1, %s3969_s23   ;;  %p4179_p9 = por %p260_p7, %p259_p6 }
  0x31   : > { %4792 = sst [smem:[#allocation28_spill]] %s4171_s0  ;;  %s4184_s28 = sshll.u32 %s3981_s25, 4 }
  0x32   : > { %p4186_p10 = pnand %p3557_p8, %p255_p5  ;;  %s4191_s1 = sand.u32 1, %s3989_s26  }
  0x33   : > { %s4795_s9 = sld [smem:[#allocation38_spill]]  ;;  %s700_s0 = scalar_lea.vmem [#allocation5], %s4177_s21 }
  0x34   : > { %s707_s23 = sshll.u32 %s700_s0, 4  ;;  %p3185_p11 = scmp.ge.s32.totalorder %s3989_s26, 1  ;;  %s708_s23 = int_to_ptr.vmem [resolvable:$true] %s707_s23 }
  0x35   : > { %p842_p12 = scmp.lt.s32.totalorder %s3989_s26, 5  ;;  %s4760_s25 = scalar_lea.sflag [#allocation6], %s4191_s1 }
  0x36   : > { %p4203_p13 = pneg %p4186_p10  ;;  %s3696_s18 = scalar_lea.vmem %s708_s23, 16 }
  0x37   : > { %p3697_p0 = scmp.ne.s32.totalorder %s708_s23, %s3696_s18  ;;  %s3991_s27 = smov [#allocation5]  }
  0x38   : > { %s3701_s29 = sshll.u32 %s3991_s27, 4  ;;  %s3702_s29 = int_to_ptr.vmem [resolvable:$false] %s3701_s29 }
  0x39   : > { %s705_s4 = scalar_lea.hbm %s4795_s9, %s4184_s28  ;;  %p3699_p1 = pnand %p3697_p0, %p4203_p13 }
  0x3a   : > { %s3703_s9 = scalar_lea.vmem %s3702_s29, 32  ;;  %p3704_p3 = scmp.lt.s32.totalorder %s708_s23, %s3702_s29 }
  0x3b   : > { %p3700_p2 = pneg %p3699_p1  ;;  %p3705_p4 = scmp.lt.s32.totalorder %s3703_s9, %s3696_s18 }
  0x3d   : > { %p3706_p5 = por %p3705_p4, %p3704_p3 }
  0x3f   : > { %p3707_p6 = pnand %p3706_p5, %p3700_p2 }
  0x41   : > { %3710 = shalt.err (!%p3707_p6)
}
  0x42   : > { %3538 = dma.hbm_to_vmem [thread:$0]  (!%p4186_p10), %s705_s4, 16, %s708_s23, %s4760_s25  }
  0x43   : > { %p4217_p7 = pnand %p3185_p11, %p842_p12  ;;  %s4798_s13 = sld [smem:[#allocation42_spill]] }
  0x44   : > { %s750_s29 = scalar_lea.vmem [#allocation8], %s4177_s21  ;;  %s4761_s16 = scalar_lea.sflag [#allocation9], %s4191_s1 }
  0x45   : > { %s757_s12 = sshll.u32 %s750_s29, 4  ;;  %s3992_s23 = smov [#allocation8]   ;;  %s758_s12 = int_to_ptr.vmem [resolvable:$true] %s757_s12 }
  0x46   : > { %s3724_s10 = scalar_lea.vmem %s758_s12, 16  ;;  %s3729_s4 = sshll.u32 %s3992_s23, 4  ;;  %s3730_s4 = int_to_ptr.vmem [resolvable:$false] %s3729_s4 }
  0x47   : > { %p3725_p8 = scmp.ne.s32.totalorder %s758_s12, %s3724_s10  ;;  %s3731_s25 = scalar_lea.vmem %s3730_s4, 32 }
  0x48   : > { %p3732_p11 = scmp.lt.s32.totalorder %s758_s12, %s3730_s4  ;;  %p3733_p12 = scmp.lt.s32.totalorder %s3731_s25, %s3724_s10 }
  0x49   : > { %s755_s27 = scalar_lea.hbm %s4798_s13, %s4184_s28  ;;  %p3727_p0 = pnand %p3725_p8, %p4203_p13 }
  0x4a   : > { %p3734_p2 = por %p3733_p12, %p3732_p11 }
  0x4b   : > { %p3728_p1 = pneg %p3727_p0 }
  0x4d   : > { %p3735_p3 = pnand %p3734_p2, %p3728_p1 }
  0x4f   : > { %3738 = shalt.err (!%p3735_p3)
}
  0x50   : > { %3544 = dma.hbm_to_vmem [thread:$0]  (!%p4186_p10), %s755_s27, 16, %s758_s12, %s4761_s16  }
  0x51   : > { %s4799_s15 = sld [smem:[#allocation44_spill]]  ;;  %s784_s23 = scalar_lea.vmem [#allocation11], %s4177_s21 }
  0x52   : > { %s791_s13 = sshll.u32 %s784_s23, 4  ;;  %s782_s10 = scalar_lea.sflag [#allocation12], %s4191_s1  ;;  %s792_s13 = int_to_ptr.vmem [resolvable:$true] %s791_s13 }
  0x53   : > { %s3752_s25 = scalar_lea.vmem %s792_s13, 16  ;;  %s3993_s4 = smov [#allocation11]  }
  0x54   : > { %p3753_p4 = scmp.ne.s32.totalorder %s792_s13, %s3752_s25  ;;  %s3757_s8 = sshll.u32 %s3993_s4, 4  ;;  %s3758_s8 = int_to_ptr.vmem [resolvable:$false] %s3757_s8 }
  0x55   : > { %s3759_s6 = scalar_lea.vmem %s3758_s8, 32  ;;  %p3760_p8 = scmp.lt.s32.totalorder %s792_s13, %s3758_s8 }
  0x56   : > { %p3755_p5 = pnand %p3753_p4, %p4203_p13  ;;  %p3761_p0 = scmp.lt.s32.totalorder %s3759_s6, %s3752_s25 }
  0x57   : > { %s789_s29 = scalar_lea.hbm %s4799_s15, %s4184_s28 }
  0x58   : > { %p3756_p6 = pneg %p3755_p5  ;;  %p3762_p1 = por %p3761_p0, %p3760_p8 }
  0x5a   : > { %p3763_p11 = pnand %p3762_p1, %p3756_p6 }
  0x5c   : > { %3766 = shalt.err (!%p3763_p11)
}
  0x5d   : > { %3550 = dma.hbm_to_vmem [thread:$0]  (!%p4186_p10), %s789_s29, 16, %s792_s13, %s782_s10  }
  0x5e   : > { %s4800_s7 = sld [smem:[#allocation36_spill]]  ;;  %s675_s18 = scalar_lea.vmem [#allocation3], %s4177_s21 }
  0x5f   : > { %s682_s8 = sshll.u32 %s675_s18, 4  ;;  %s4801_s11 = sld [smem:[#allocation40_spill]]  ;;  %s683_s8 = int_to_ptr.vmem [resolvable:$true] %s682_s8 }
  0x60   : > { %s673_s4 = scalar_lea.sflag [#allocation4], %s4177_s21  ;;  %s3780_s16 = scalar_lea.vmem %s683_s8, 16 }
  0x61   : > { %p3781_p12 = scmp.ne.s32.totalorder %s683_s8, %s3780_s16  ;;  %s3994_s15 = smov [#allocation3]  }
  0x62   : > { %s3785_s5 = sshll.u32 %s3994_s15, 4  ;;  %s3786_s5 = int_to_ptr.vmem [resolvable:$false] %s3785_s5 }
  0x63   : > { %p3783_p2 = pnand %p3781_p12, %p4203_p13  ;;  %s3787_s13 = scalar_lea.vmem %s3786_s5, 32 }
  0x64   : > { %s680_s9 = scalar_lea.hbm %s4800_s7, %s4184_s28  ;;  %p3788_p4 = scmp.lt.s32.totalorder %s683_s8, %s3786_s5 }
  0x65   : > { %s730_s25 = scalar_lea.hbm %s4801_s11, %s4184_s28  ;;  %p3784_p3 = pneg %p3783_p2 }
  0x66   : > { %p3789_p5 = scmp.lt.s32.totalorder %s3787_s13, %s3780_s16 }
  0x68   : > { %p3790_p6 = por %p3789_p5, %p3788_p4 }
  0x6a   : > { %p3791_p8 = pnand %p3790_p6, %p3784_p3 }
  0x6c   : > { %3794 = shalt.err (!%p3791_p8)
}
  0x6d   : > { %3535 = dma.hbm_to_vmem [thread:$0]  (!%p4186_p10), %s680_s9, 16, %s683_s8, %s673_s4  }
  0x6e   : > { %s725_s29 = scalar_lea.vmem [#allocation7], %s4177_s21  ;;  %s4802_s14 = sld [smem:[#allocation43_spill]] }
  0x6f   : > { %s732_s12 = sshll.u32 %s725_s29, 4  ;;  %s3995_s5 = smov [#allocation7]   ;;  %s733_s12 = int_to_ptr.vmem [resolvable:$true] %s732_s12 }
  0x70   : > { %s3808_s6 = scalar_lea.vmem %s733_s12, 16  ;;  %s3813_s16 = sshll.u32 %s3995_s5, 4  ;;  %s3814_s16 = int_to_ptr.vmem [resolvable:$false] %s3813_s16 }
  0x71   : > { %p3809_p0 = scmp.ne.s32.totalorder %s733_s12, %s3808_s6  ;;  %s3815_s23 = scalar_lea.vmem %s3814_s16, 32 }
  0x72   : > { %p3816_p12 = scmp.lt.s32.totalorder %s733_s12, %s3814_s16  ;;  %p3817_p2 = scmp.lt.s32.totalorder %s3815_s23, %s3808_s6 }
  0x73   : > { %p3811_p1 = pnand %p3809_p0, %p4203_p13 }
  0x74   : > { %s772_s15 = scalar_lea.hbm %s4802_s14, %s4184_s28  ;;  %p3818_p3 = por %p3817_p2, %p3816_p12 }
  0x75   : > { %p3812_p11 = pneg %p3811_p1 }
  0x77   : > { %p3819_p4 = pnand %p3818_p3, %p3812_p11 }
  0x79   : > { %3822 = shalt.err (!%p3819_p4)
}
  0x7a   : > { %s4803_s9 = scalar_lea.sflag [#allocation6], %s4191_s1  ;;  %s767_s13 = scalar_lea.vmem [#allocation10], %s4177_s21 }
  0x7b   : > { %3541 = dma.hbm_to_vmem [thread:$0]  (!%p4186_p10), %s730_s25, 16, %s733_s12, %s4803_s9  }
  0x7c   : > { %s774_s29 = sshll.u32 %s767_s13, 4  ;;  %s4804_s17 = sld [smem:[#allocation46_spill]]  ;;  %s775_s29 = int_to_ptr.vmem [resolvable:$true] %s774_s29 }
  0x7d   : > { %s3836_s5 = scalar_lea.vmem %s775_s29, 16  ;;  %s3996_s16 = smov [#allocation10]  }
  0x7e   : > { %p3837_p5 = scmp.ne.s32.totalorder %s775_s29, %s3836_s5  ;;  %s3841_s23 = sshll.u32 %s3996_s16, 4  ;;  %s3842_s23 = int_to_ptr.vmem [resolvable:$false] %s3841_s23 }
  0x7f   : > { %s3843_s8 = scalar_lea.vmem %s3842_s23, 32  ;;  %p3844_p0 = scmp.lt.s32.totalorder %s775_s29, %s3842_s23 }
  0x80   : > { %p3839_p6 = pnand %p3837_p5, %p4203_p13  ;;  %p3845_p1 = scmp.lt.s32.totalorder %s3843_s8, %s3836_s5 }
  0x82   : > { %s812_s6 = scalar_lea.hbm %s4804_s17, %s4184_s28  ;;  %p3840_p8 = pneg %p3839_p6 }
  0x83   : > { %p3846_p11 = por %p3845_p1, %p3844_p0 }
  0x85   : > { %p3847_p12 = pnand %p3846_p11, %p3840_p8 }
  0x87   : > { %3850 = shalt.err (!%p3847_p12)
}
  0x88   : > { %s4805_s25 = scalar_lea.sflag [#allocation9], %s4191_s1  ;;  %s807_s4 = scalar_lea.vmem [#allocation13], %s4177_s21 }
  0x89   : > { %3547 = dma.hbm_to_vmem [thread:$0]  (!%p4186_p10), %s772_s15, 16, %s775_s29, %s4805_s25  }
  0x8a   : > { %s814_s13 = sshll.u32 %s807_s4, 4  ;;  %s3997_s18 = smov [#allocation13]   ;;  %s815_s13 = int_to_ptr.vmem [resolvable:$true] %s814_s13 }
  0x8b   : > { %s3864_s27 = scalar_lea.vmem %s815_s13, 16  ;;  %s3869_s5 = sshll.u32 %s3997_s18, 4  ;;  %s3870_s5 = int_to_ptr.vmem [resolvable:$false] %s3869_s5 }
  0x8c   : > { %p3865_p2 = scmp.ne.s32.totalorder %s815_s13, %s3864_s27  ;;  %s3871_s16 = scalar_lea.vmem %s3870_s5, 32 }
  0x8d   : > { %p3872_p5 = scmp.lt.s32.totalorder %s815_s13, %s3870_s5  ;;  %p3873_p6 = scmp.lt.s32.totalorder %s3871_s16, %s3864_s27 }
  0x8e   : > { %p3867_p3 = pnand %p3865_p2, %p4203_p13 }
  0x8f   : > { %p3874_p8 = por %p3873_p6, %p3872_p5 }
  0x90   : > { %p3868_p4 = pneg %p3867_p3 }
  0x92   : > { %p3875_p0 = pnand %p3874_p8, %p3868_p4 }
  0x94   : > { %3878 = shalt.err (!%p3875_p0)
}
  0x95   : > { %3553 = dma.hbm_to_vmem [thread:$0]  (!%p4186_p10), %s812_s6, 16, %s815_s13, %s782_s10  }
  0x96   : > { %s4806_s19 = sld [smem:[#allocation48_spill]]  ;;  %s830_s12 = scalar_lea.vmem [#allocation14], %s4177_s21 }
  0x97   : > { %s837_s9 = sshll.u32 %s830_s12, 4  ;;  %s828_s4 = scalar_lea.sflag [#allocation15], %s4177_s21  ;;  %s838_s9 = int_to_ptr.vmem [resolvable:$true] %s837_s9 }
  0x98   : > { %s3892_s27 = scalar_lea.vmem %s838_s9, 16  ;;  %s3998_s1 = smov [#allocation14]  }
  0x99   : > { %p3893_p1 = scmp.ne.s32.totalorder %s838_s9, %s3892_s27  ;;  %s3897_s18 = sshll.u32 %s3998_s1, 4  ;;  %s3898_s18 = int_to_ptr.vmem [resolvable:$false] %s3897_s18 }
  0x9a   : > { %s3899_s5 = scalar_lea.vmem %s3898_s18, 32  ;;  %p3900_p2 = scmp.lt.s32.totalorder %s838_s9, %s3898_s18 }
  0x9b   : > { %p3895_p11 = pnand %p3893_p1, %p4203_p13  ;;  %p3901_p3 = scmp.lt.s32.totalorder %s3899_s5, %s3892_s27 }
  0x9c   : > { %s835_s25 = scalar_lea.hbm %s4806_s19, %s4184_s28 }
  0x9d   : > { %p3896_p12 = pneg %p3895_p11  ;;  %p3902_p4 = por %p3901_p3, %p3900_p2 }
  0x9f   : > { %p3903_p5 = pnand %p3902_p4, %p3896_p12 }
  0xa1   : > { %3906 = shalt.err (!%p3903_p5)
}
  0xa2   : > { %3556 = dma.hbm_to_vmem [thread:$0]  (!%p4186_p10), %s835_s25, 16, %s838_s9, %s828_s4  }
  0xa3   : > { %846 = sbr.rel (%p4217_p7) target bundleno = 6440 (0x1928), region = 100  ;;  %s4316_s20 = sand.u32 (!%p4217_p7), 1, %s3965_s22  }
  0xa4   : > { %s849_s28 = scalar_lea.sflag (!%p4217_p7), [#allocation4], %s4316_s20 }
  0xa8   : > { %3940 = dma.done.wait (%p4179_p9), %s849_s28, 16  }
  0xa9   : > { %3942 = vsyncadd (%p4179_p9), %s849_s28, 4294967280  ;;  %s4807_s10 = sadd.s32 4294967295, %s3989_s26  }
  0xaa   : > { %s856_s30 = sand.u32 1, %s4807_s10  }
  0xab   : > { %s857_s0 = scalar_lea.sflag [#allocation6], %s856_s30 }
  0xac   : > { %3944 = dma.done.wait (%p4179_p9), %s857_s0, 32  }
  0xad   : > { %3946 = vsyncadd (%p4179_p9), %s857_s0, 4294967264  ;;  %s873_s16 = scalar_lea.sflag [#allocation9], %s856_s30 }
  0xae   : > { %3948 = dma.done.wait (%p4179_p9), %s873_s16, 32  }
  0xaf   : > { %3950 = vsyncadd (%p4179_p9), %s873_s16, 4294967264  ;;  %s889_s23 = scalar_lea.sflag [#allocation12], %s856_s30 }
  0xb0   : > { %3952 = dma.done.wait (%p4179_p9), %s889_s23, 32  }
  0xb1   : > { %3954 = vsyncadd (%p4179_p9), %s889_s23, 4294967264  ;;  %s905_s12 = scalar_lea.sflag [#allocation15], %s4316_s20 }
  0xb2   : > { %3956 = dma.done.wait (%p4179_p9), %s905_s12, 16  }
  0xb3   : > { %3958 = vsyncadd (%p4179_p9), %s905_s12, 4294967280  ;;  %p1041_p10 = scmp.lt.s32.totalorder %s3977_s2, 1  ;;  %p1050_p13 = scmp.lt.s32.totalorder %s3973_s24, 1 }
  0xb4   : > { %s4808_s5 = sld [smem:[#allocation29_spill]]  ;;  %p3202_p9 = scmp.ne.s32.totalorder %s3973_s24, 0 }
  0xb5   : > { %s4850_s2 = smov (!%p1041_p10, %s3977_s2), 1  ;;  %s4809_s0 = sld [smem:[#allocation30_spill]] }
  0xb6   : > { %s4354_s4 = scalar_select %p1050_p13, %s3973_s24, 1 }
  0xb7   : > { %s3186_s27 = sshll.u32 %s4850_s2, 3  ;;  %s3256_s1 = sshll.u32 %s4850_s2, 4 }
  0xb8   : > { %s3257_s23 = sshll.u32 %s4354_s4, 4  ;;  %s4811_s8 = sld [smem:[#allocation31_spill]] }
  0xb9   : > { %s4812_s7 = sld [smem:[#allocation33_spill]] }
  0xba   : > { %s1044_s28 = scalar_lea.vmem %s4808_s5, %s3186_s27  ;;  %s4815_s12 = sld [smem:[#allocation37_spill]] }
  0xbb   : > { %s4362_s16 = scalar_lea.vmem %s4809_s0, %s3256_s1  ;;  %s4814_s0 = sld [smem:[#allocation35_spill]] }
  0xbc   : > { %s4816_s25 = sld [smem:[#allocation39_spill]] }
  0xbd   : > { %s4817_s18 = sld [smem:[#allocation45_spill]] }
  0xbe   : > { %s1054_s29 = scalar_lea.vmem %s4811_s8, %s3257_s23  ;;  %s4818_s1 = sld [smem:[#allocation41_spill]] }
  0xbf   : > { %s4375_s11 = scalar_lea.vmem %s4812_s7, %s3257_s23  ;;  %s3262_s7 = sshll.u32 %s4354_s4, 5 }
  0xc0   : > { %s4389_s13 = scalar_lea.vmem %s4815_s12, %s3257_s23  ;;  %s4819_s9 = sld [smem:[#allocation47_spill]] }
  0xc1   : > { %s4384_s14 = scalar_lea.vmem %s4814_s0, %s3257_s23  ;;  %s4820_s26 = sld [smem:[#allocation49_spill]] }
  0xc2   : > { %s4394_s21 = scalar_lea.vmem %s4816_s25, %s3257_s23 }
  0xc3   : > { %s1088_s3 = scalar_lea.vmem %s4817_s18, %s4354_s4  ;;  %1100 = sbr.rel (%p3202_p9) target bundleno = 202 (0xca), region = 136 }
  0xc4   : > { %s4404_s30 = scalar_lea.vmem %s4818_s1, %s3262_s7 }
  0xc6   : > { %s1091_s15 = scalar_lea.vmem %s4819_s9, %s4354_s4 }
  0xc7   : > { %s4413_s6 = scalar_lea.vmem %s4820_s26, %s3186_s27 }
  0xc8   : > { %v1101_v0 = vld [vmem:[%s1044_s28] sm:$0xff]  ;;  %vm1102_vm0 = vcmask 261120  }
  0xc9   : > { %1103 = vst.msk [vmem:[#allocation2] sm:$0xff] %vm1102_vm0, %v1101_v0 }
  0xca PF: > { %v3635_v1 = vld [vmem:[%s1054_s29 + $0x8] sm:$0xff]   ;;  %v3999_v2 = vmov 0.0   ;;  %v3636_v3 = vld [vmem:[%s1054_s29] sm:$0xff]   ;;  %vm4000_vm1 = vmmov 0   ;;  %vm1131_vm2 = vcmask 261120   ;;  %s4821_s22 = sld [smem:[#allocation32_spill]] }
  0xcb   : > { %3328 = vmatprep.subr.bf16.mxu1 %v3999_v2  ;;  %3342 = vmatprep.subr.bf16.mxu0 %v3999_v2  ;;  %s4001_s26 = smov 120   ;;  %s4002_s29 = smov 96   ;;  %vm1183_vm3 = vcmask 64512   ;;  %vm1248_vm4 = vcmask 1043456   ;;  %v1175_v52 = vld [vmem:[%s4375_s11] sm:$0xf] }
  0xcc   : > { %3329 = vmatpush3.bf16.msra.mxu1 %v3635_v1  ;;  %3332 = vmatprep.mubr.msk.bf16.mxu1 %vm4000_vm1, %v3999_v2  ;;  %s4003_s27 = smov 88   ;;  %s4004_s28 = smov 64   ;;  %v1455_v53 = vsel %vm1248_vm4, %v1175_v52, 0  ;;  %v1176_v54 = vld [vmem:[%s4375_s11 + $0x4] sm:$0xf]  ;;  %vm2028_vm5 = vcmask 80896  }
  0xcd   : > { %3330 = vmatprep.subr.bf16.mxu1 %v3999_v2  ;;  %3344 = vmatprep.mubr.msk.bf16.mxu0 %vm4000_vm1, %v3999_v2  ;;  %s4005_s23 = smov 56   ;;  %s4006_s10 = smov 112   ;;  %v1409_v55 = vsel %vm1248_vm4, %v1176_v54, 0  ;;  %vm2047_vm6 = vcmask 1044480   ;;  %vm2761_vm7 = vcmask 523264  }
  0xce   : > { %s4007_s8 = smov 80   ;;  %s4008_s25 = smov 72  }
  0xcf   : > { %s4009_s7 = smov 104   ;;  %s4010_s2 = smov 48  }
  0xd0   : > { %v4420_v4 = vld [vmem:[#allocation2] sm:$0xff]  ;;  %3331 = vmatpush3.bf16.msra.mxu1 %v3636_v3  ;;  %s4822_s24 = scalar_lea.vmem %s4821_s22, %s4354_s4  ;;  %s4011_s18 = smov 40  }
  0xd1   : > { %v1112_v5 = vpack.c.bf16 %v4420_v4, %v4420_v4  ;;  %3336 = vmatprep.subr.bf16.mxu1 %v3999_v2  ;;  %v3203_v6 = vld [vmem:[%s4822_s24] ss:$0 sm:$0xff]  ;;  %s4823_s1 = sld [smem:[#allocation34_spill]]  ;;  %s4825_s9 = scalar_lea.vmem [#allocation3], %s4316_s20 }
  0xd2   : > { %s4827_s12 = scalar_lea.vmem [#allocation11], %s4316_s20  ;;  %s4830_s19 = scalar_lea.vmem [#allocation13], %s4316_s20 }
  0xd3   : > { %3333 = vmatmul.mubr.msk.bf16.vlgmr.msra.gmra.mxu1 %vm1131_vm2, %v1112_v5  ;;  %s4831_s22 = scalar_lea.vmem [#allocation7], %s4316_s20 }
  0xd4   : > { %3338 = vmatprep.mubr.msk.bf16.mxu1 %vm4000_vm1, %v3999_v2 }
  0xd7   : > { %s4824_s0 = scalar_lea.vmem %s4823_s1, %s4354_s4 }
 0x193   : > { %v1169_v7 = vpop.f32.mrf.mxu1 }
 0x194   : > { %v1170_v8 = vadd.f32 %v3203_v6, %v1169_v7 }
 0x195   : > { %v3334_v9 = vpop.f32.mrf.mxu1 }
 0x196   : > { %v4436_v10 = vpack.c.bf16 %v1170_v8, %v1170_v8 }
 0x197   : > { %v1172_v11 = vpop.f32.mrf.mxu1 }
 0x198   : > { %1293 = vrot.lane.b32.xlu1 %v4436_v10, %s4001_s26  ;;  %1181 = vrot.lane.b32.xlu0 %v4436_v10, %s4002_s29 }
 0x199   : > { %v3335_v12 = vpop.f32.mrf.mxu1 }
 0x19c   : > { %1295 = vrot.lane.b32.xlu0 %v4436_v10, %s4003_s27 }
 0x20a   : > { %v1182_v13 = vpop.permute.xlu0 %1181  ;;  %v1294_v17 = vpop.permute.xlu1 %1293 }
 0x20b   : > { %v1188_v14 = vsel %vm1183_vm3, %v1182_v13, 0 }
 0x20c   : > { %3337 = vmatpush3.bf16.xpose.msra.mxu1 %v1188_v14 }
 0x20d   : > { %3348 = vmatprep.subr.bf16.mxu1 %v3999_v2 }
 0x20e   : > { %v1296_v15 = vpop.permute.xlu0 %1295 }
 0x20f   : > { %v1301_v16 = vsel %vm1183_vm3, %v1296_v15, 0 }
 0x213   : > { %3339 = vmatmul.mubr.msk.bf16.vlgmr.msra.gmra.mxu1 %vm1183_vm3, %v4436_v10 }
 0x214   : > { %3349 = vmatpush3.bf16.xpose.msra.mxu1 %v1301_v16  ;;  %3350 = vmatprep.mubr.msk.bf16.mxu1 %vm4000_vm1, %v3999_v2 }
 0x215   : > { %3360 = vmatprep.subr.bf16.mxu1 %v3999_v2 }
 0x21b   : > { %3351 = vmatmul.mubr.msk.bf16.vlgmr.msra.gmra.mxu1 %vm1183_vm3, %v1294_v17 }
 0x21c   : > { %3362 = vmatprep.mubr.msk.bf16.mxu1 %vm4000_vm1, %v3999_v2  ;;  %3361 = vmatpush3.bf16.msra.mxu1 %v1409_v55 }
 0x21d   : > { %3372 = vmatprep.subr.bf16.mxu1 %v3999_v2 }
 0x2d3   : > { %v1224_v18 = vpop.f32.mrf.mxu1 }
 0x2d4   : > { %v1230_v19 = vmul.f32 0.35355338, %v1224_v18 }
 0x2d5   : > { %v3340_v20 = vpop.f32.mrf.mxu1 }
 0x2d6   : > { %v1231_v21 = vsel %vm1183_vm3, %v1230_v19, -inf }
 0x2d7   : > { %1232 = vmax.xlane.f32.xlu1 %v1231_v21  ;;  %v1227_v22 = vpop.f32.mrf.mxu1 }
 0x2d9   : > { %v3341_v23 = vpop.f32.mrf.mxu1 }
 0x2db   : > { %v1337_v24 = vpop.f32.mrf.mxu1 }
 0x2dc   : > { %v1343_v25 = vmul.f32 0.35355338, %v1337_v24 }
 0x2dd   : > { %v3352_v26 = vpop.f32.mrf.mxu1 }
 0x2de   : > { %v1344_v27 = vsel %vm1183_vm3, %v1343_v25, -inf }
 0x2df   : > { %1345 = vmax.xlane.f32.xlu0 %v1344_v27  ;;  %v1340_v28 = vpop.f32.mrf.mxu1 }
 0x2e1   : > { %v3353_v29 = vpop.f32.mrf.mxu1 }
 0x360   : > { %v1233_v30 = vpop.xlane.xlu1 %1232 }
 0x361   : > { %v1234_v31 = vsub.f32 %v1230_v19, %v1233_v30 }
 0x363   : > { %v1235_v32 = vmul.f32 1.442695, %v1234_v31 }
 0x365   : > { %3645 = vpow2.f32 %v1235_v32 }
 0x368   : > { %v1346_v33 = vpop.xlane.xlu0 %1345 }
 0x369   : > { %v1347_v34 = vsub.f32 %v1343_v25, %v1346_v33 }
 0x36b   : > { %v1348_v35 = vmul.f32 1.442695, %v1347_v34 }
 0x36d   : > { %3647 = vpow2.f32 %v1348_v35 }
 0x372   : > { %v3646_v36 = vpop.eup %3645 }
 0x373   : > { %v1237_v37 = vsel %vm1183_vm3, %v3646_v36, 0.0 }
 0x374   : > { %1238 = vadd.xlane.f32.xlu0 %v1237_v37  ;;  %v1177_v37 = vld [vmem:[%s4375_s11 + $0x8] sm:$0xf] }
 0x37a   : > { %v3648_v38 = vpop.eup %3647 }
 0x37b   : > { %v1350_v39 = vsel %vm1183_vm3, %v3648_v38, 0.0 }
 0x37c   : > { %1351 = vadd.xlane.f32.xlu1 %v1350_v39 }
 0x38a   : > { %1243 = vrot.lane.b32.xlu0 %v4436_v10, %s4004_s28 }
 0x38d   : > { %1356 = vrot.lane.b32.xlu1 %v4436_v10, %s4005_s23 }
 0x38e   : > { %1497 = vrot.lane.b32.xlu0 %v4436_v10, %s4006_s10 }
 0x391   : > { %1499 = vrot.lane.b32.xlu1 %v4436_v10, %s4007_s8 }
 0x3fd   : > { %v1239_v40 = vpop.xlane.xlu0 %1238 }
 0x3fe   : > { %3649 = vrcp.f32 %v1239_v40 }
 0x401   : > { %v1244_v41 = vpop.permute.xlu0 %1243 }
 0x402   : > { %v1250_v42 = vsel %vm1248_vm4, %v1244_v41, 0 }
 0x403   : > { %3343 = vmatpush3.bf16.msra.mxu0 %v1250_v42 }
 0x404   : > { %3354 = vmatprep.subr.bf16.mxu0 %v3999_v2 }
 0x405   : > { %v1352_v43 = vpop.xlane.xlu1 %1351  ;;  %v1498_v6 = vpop.permute.xlu0 %1497 }
 0x406   : > { %3651 = vrcp.f32 %v1352_v43 }
 0x409   : > { %v1357_v46 = vpop.permute.xlu1 %1356 }
 0x40a   : > { %v1362_v48 = vsel %vm1248_vm4, %v1357_v46, 0 }
 0x40b   : > { %v3650_v44 = vpop.eup %3649 }
 0x40c   : > { %v1241_v45 = vmul.f32 %v3650_v44, %v3646_v36 }
 0x40d   : > { %v1500_v61 = vpop.permute.xlu1 %1499 }
 0x40e   : > { %v1242_v47 = vpack.c.bf16 %v1241_v45, %v1241_v45  ;;  %v1505_v1 = vsel %vm1183_vm3, %v1500_v61, 0 }
 0x410   : > { %3345 = vmatmul.mubr.msk.bf16.vlgmr.msra.gmra.mxu0 %vm1183_vm3, %v1242_v47 }
 0x411   : > { %3355 = vmatpush3.bf16.msra.mxu0 %v1362_v48  ;;  %3356 = vmatprep.mubr.msk.bf16.mxu0 %vm4000_vm1, %v3999_v2 }
 0x412   : > { %3366 = vmatprep.subr.bf16.mxu0 %v3999_v2 }
 0x413   : > { %v3652_v49 = vpop.eup %3651 }
 0x414   : > { %v1354_v50 = vmul.f32 %v3652_v49, %v3648_v38  ;;  %v1613_v38 = vsel %vm1248_vm4, %v1177_v37, 0 }
 0x416   : > { %v1355_v51 = vpack.c.bf16 %v1354_v50, %v1354_v50 }
 0x418   : > { %3357 = vmatmul.mubr.msk.bf16.vlgmr.msra.gmra.mxu0 %vm1183_vm3, %v1355_v51 }
 0x419   : > { %3368 = vmatprep.mubr.msk.bf16.mxu0 %vm4000_vm1, %v3999_v2  ;;  %3367 = vmatpush3.bf16.msra.mxu0 %v1455_v53 }
 0x41a   : > { %3378 = vmatprep.subr.bf16.mxu0 %v3999_v2 }
 0x4d0   : > { %v1286_v56 = vpop.f32.mrf.mxu0 }
 0x4d1   : > { %v1292_v57 = vpack.c.bf16 %v1286_v56, %v1286_v56 }
 0x4d2   : > { %v3346_v58 = vpop.f32.mrf.mxu0 }
 0x4d3   : > { %3369 = vmatmul.mubr.msk.bf16.vlgmr.msra.gmra.mxu0 %vm1183_vm3, %v1292_v57 }
 0x4d4   : > { %v1289_v59 = vpop.f32.mrf.mxu0  ;;  %3380 = vmatprep.mubr.msk.bf16.mxu0 %vm4000_vm1, %v3999_v2 }
 0x4d6   : > { %v3347_v60 = vpop.f32.mrf.mxu0 }
 0x4d7   : > { %v1178_v60 = vld [vmem:[%s4375_s11 + $0xc] sm:$0xf] }
 0x4d8   : > { %v1398_v62 = vpop.f32.mrf.mxu0 }
 0x4d9   : > { %v1404_v63 = vpack.c.bf16 %v1398_v62, %v1398_v62 }
 0x4da   : > { %v3358_v0 = vpop.f32.mrf.mxu0 }
 0x4db   : > { %3363 = vmatmul.mubr.msk.bf16.vlgmr.msra.gmra.mxu1 %vm1183_vm3, %v1404_v63 }
 0x4dc   : > { %3373 = vmatpush3.bf16.xpose.msra.mxu1 %v1505_v1  ;;  %v1401_v3 = vpop.f32.mrf.mxu0  ;;  %3374 = vmatprep.mubr.msk.bf16.mxu1 %vm4000_vm1, %v3999_v2 }
 0x4dd   : > { %3384 = vmatprep.subr.bf16.mxu1 %v3999_v2 }
 0x4de   : > { %v3359_v5 = vpop.f32.mrf.mxu0 }
 0x4e3   : > { %3375 = vmatmul.mubr.msk.bf16.vlgmr.msra.gmra.mxu1 %vm1183_vm3, %v1498_v6 }
 0x4e4   : > { %3386 = vmatprep.mubr.msk.bf16.mxu1 %vm4000_vm1, %v3999_v2  ;;  %3385 = vmatpush3.bf16.msra.mxu1 %v1613_v38  ;;  %v3221_v38 = vld [vmem:[%s4827_s12] ss:$0 sm:$0xff] }
 0x4e5   : > { %3396 = vmatprep.subr.bf16.mxu1 %v3999_v2 }
 0x593   : > { %v1491_v7 = vpop.f32.mrf.mxu0 }
 0x595   : > { %v3370_v8 = vpop.f32.mrf.mxu0 }
 0x597   : > { %v1494_v9 = vpop.f32.mrf.mxu0 }
 0x599   : > { %v3371_v11 = vpop.f32.mrf.mxu0 }
 0x59b   : > { %v1445_v12 = vpop.f32.mrf.mxu1 }
 0x59c   : > { %v4492_v13 = vadd.f32 %v1491_v7, %v1445_v12  ;;  %v3219_v12 = vld [vmem:[%s4824_s0] ss:$0 sm:$0xff] }
 0x59d   : > { %v3364_v14 = vpop.f32.mrf.mxu1 }
 0x59f   : > { %v1448_v15 = vpop.f32.mrf.mxu1 }
 0x5a1   : > { %v3365_v16 = vpop.f32.mrf.mxu1 }
 0x5a3   : > { %v1541_v17 = vpop.f32.mrf.mxu1 }
 0x5a4   : > { %v1547_v18 = vmul.f32 0.35355338, %v1541_v17 }
 0x5a5   : > { %v3376_v19 = vpop.f32.mrf.mxu1 }
 0x5a6   : > { %v1548_v20 = vsel %vm1183_vm3, %v1547_v18, -inf }
 0x5a7   : > { %1549 = vmax.xlane.f32.xlu1 %v1548_v20  ;;  %v1544_v21 = vpop.f32.mrf.mxu1  ;;  %v3637_v20 = vld [vmem:[%s4384_s14 + $0x8] sm:$0xff]  }
 0x5a8   : > { %v3638_v21 = vld [vmem:[%s4384_s14] sm:$0xff]   ;;  %s4826_s14 = scalar_lea.vmem [#allocation10], %s4316_s20 }
 0x5a9   : > { %v3377_v22 = vpop.f32.mrf.mxu1 }
 0x5b8   : > { %1658 = vrot.lane.b32.xlu1 %v4436_v10, %s4008_s25 }
 0x5bc   : > { %1656 = vrot.lane.b32.xlu1 %v4436_v10, %s4009_s7 }
 0x630   : > { %v1550_v23 = vpop.xlane.xlu1 %1549 }
 0x631   : > { %v1551_v24 = vsub.f32 %v1547_v18, %v1550_v23 }
 0x633   : > { %v1552_v25 = vmul.f32 1.442695, %v1551_v24 }
 0x634   : > { %v1659_v33 = vpop.permute.xlu1 %1658 }
 0x635   : > { %3653 = vpow2.f32 %v1552_v25  ;;  %v1664_v35 = vsel %vm1183_vm3, %v1659_v33, 0 }
 0x638   : > { %v1657_v36 = vpop.permute.xlu1 %1656 }
 0x642   : > { %v3654_v26 = vpop.eup %3653 }
 0x643   : > { %v1554_v27 = vsel %vm1183_vm3, %v3654_v26, 0.0 }
 0x644   : > { %1555 = vadd.xlane.f32.xlu0 %v1554_v27 }
 0x65a   : > { %1560 = vrot.lane.b32.xlu0 %v4436_v10, %s4010_s2 }
 0x6cd   : > { %v1556_v28 = vpop.xlane.xlu0 %1555 }
 0x6ce   : > { %3655 = vrcp.f32 %v1556_v28 }
 0x6d1   : > { %v1561_v29 = vpop.permute.xlu0 %1560 }
 0x6d2   : > { %v1566_v30 = vsel %vm1248_vm4, %v1561_v29, 0 }
 0x6d3   : > { %3379 = vmatpush3.bf16.msra.mxu0 %v1566_v30 }
 0x6d4   : > { %3390 = vmatprep.subr.bf16.mxu0 %v3999_v2 }
 0x6db   : > { %v3656_v31 = vpop.eup %3655 }
 0x6dc   : > { %v1558_v32 = vmul.f32 %v3656_v31, %v3654_v26  ;;  %v3222_v26 = vld [vmem:[%s4825_s9] ss:$0 sm:$0xff] }
 0x6dd   : > { %v1105_v31 = vld [vmem:[%s4362_s16] sm:$0xff] }
 0x6de   : > { %v1559_v34 = vpack.c.bf16 %v1558_v32, %v1558_v32  ;;  %v1106_v32 = vld [vmem:[%s4362_s16 + $0x8] sm:$0x3] }
 0x6e0   : > { %3381 = vmatmul.mubr.msk.bf16.vlgmr.msra.gmra.mxu0 %vm1183_vm3, %v1559_v34  ;;  %v1921_v34 = vpack.c.bf16 %v1106_v32, %v1105_v31  ;;  %v1975_v31 = vld [vmem:[%s4389_s13] sm:$0xf] }
 0x6e1   : > { %3391 = vmatpush3.bf16.xpose.msra.mxu0 %v1664_v35  ;;  %3392 = vmatprep.mubr.msk.bf16.mxu0 %vm4000_vm1, %v3999_v2 }
 0x6e2   : > { %3402 = vmatprep.subr.bf16.mxu0 %v3999_v2 }
 0x6e8   : > { %3393 = vmatmul.mubr.msk.bf16.vlgmr.msra.gmra.mxu0 %vm1183_vm3, %v1657_v36  ;;  %v3220_v36 = vld [vmem:[%s4826_s14] ss:$0 sm:$0xff] }
 0x6e9   : > { %3404 = vmatprep.mubr.msk.bf16.mxu0 %vm4000_vm1, %v3999_v2 }
 0x7a0   : > { %v1602_v39 = vpop.f32.mrf.mxu0 }
 0x7a1   : > { %v1608_v40 = vpack.c.bf16 %v1602_v39, %v1602_v39 }
 0x7a2   : > { %v3382_v41 = vpop.f32.mrf.mxu0 }
 0x7a3   : > { %3387 = vmatmul.mubr.msk.bf16.vlgmr.msra.gmra.mxu1 %vm1183_vm3, %v1608_v40 }
 0x7a4   : > { %v1605_v42 = vpop.f32.mrf.mxu0  ;;  %3398 = vmatprep.mubr.msk.bf16.mxu1 %vm4000_vm1, %v3999_v2 }
 0x7a6   : > { %v3383_v43 = vpop.f32.mrf.mxu0 }
 0x7a8   : > { %v1700_v44 = vpop.f32.mrf.mxu0 }
 0x7a9   : > { %v1706_v45 = vmul.f32 0.35355338, %v1700_v44 }
 0x7aa   : > { %v3394_v46 = vpop.f32.mrf.mxu0 }
 0x7ab   : > { %v1707_v47 = vsel %vm1183_vm3, %v1706_v45, -inf }
 0x7ac   : > { %1708 = vmax.xlane.f32.xlu0 %v1707_v47  ;;  %v1703_v48 = vpop.f32.mrf.mxu0 }
 0x7ae   : > { %v3395_v49 = vpop.f32.mrf.mxu0 }
 0x7c2   : > { %1719 = vrot.lane.b32.xlu0 %v4436_v10, %s4011_s18  ;;  %v1772_v10 = vsel %vm1248_vm4, %v1178_v60, 0 }
 0x7c3   : > { %3403 = vmatpush3.bf16.msra.mxu0 %v1772_v10 }
 0x7c4   : > { %3416 = vmatprep.subr.bf16.mxu0 %v3999_v2 }
 0x7c6   : > { %1922 = vrot.lane.b32.xlu0 %v3638_v21, %s4002_s29 }
 0x7ca   : > { %1928 = vrot.lane.b32.xlu0 %v3222_v26, %s4002_s29 }
 0x835   : > { %v1709_v50 = vpop.xlane.xlu0 %1708 }
 0x836   : > { %v1710_v51 = vsub.f32 %v1706_v45, %v1709_v50 }
 0x838   : > { %v1711_v52 = vmul.f32 1.442695, %v1710_v51 }
 0x839   : > { %v1720_v53 = vpop.permute.xlu0 %1719 }
 0x83a   : > { %3657 = vpow2.f32 %v1711_v52  ;;  %v1725_v54 = vsel %vm1248_vm4, %v1720_v53, 0 }
 0x83b   : > { %3397 = vmatpush3.bf16.msra.mxu1 %v1725_v54 }
 0x83c   : > { %3408 = vmatprep.subr.bf16.mxu1 %v3999_v2 }
 0x83d   : > { %v1923_v33 = vpop.permute.xlu0 %1922 }
 0x841   : > { %v1929_v43 = vpop.permute.xlu0 %1928 }
 0x847   : > { %v3658_v55 = vpop.eup %3657 }
 0x848   : > { %v1713_v56 = vsel %vm1183_vm3, %v3658_v55, 0.0 }
 0x849   : > { %1714 = vadd.xlane.f32.xlu1 %v1713_v56 }
 0x863   : > { %v1649_v57 = vpop.f32.mrf.mxu1 }
 0x864   : > { %v1655_v58 = vadd.f32 %v1649_v57, %v4492_v13 }
 0x865   : > { %v3388_v59 = vpop.f32.mrf.mxu1 }
 0x867   : > { %v1652_v61 = vpop.f32.mrf.mxu1 }
 0x869   : > { %v3389_v62 = vpop.f32.mrf.mxu1 }
 0x8d2   : > { %v1715_v63 = vpop.xlane.xlu1 %1714 }
 0x8d3   : > { %3659 = vrcp.f32 %v1715_v63 }
 0x8e0   : > { %v3660_v0 = vpop.eup %3659 }
 0x8e1   : > { %v1717_v1 = vmul.f32 %v3660_v0, %v3658_v55 }
 0x8e3   : > { %v1718_v3 = vpack.c.bf16 %v1717_v1, %v1717_v1 }
 0x8e5   : > { %3399 = vmatmul.mubr.msk.bf16.vlgmr.msra.gmra.mxu1 %vm1183_vm3, %v1718_v3 }
 0x8e6   : > { %3412 = vmatprep.mubr.msk.bf16.mxu1 %vm4000_vm1, %v3999_v2  ;;  %3409 = vmatpush3.bf16.msra.mxu1 %v3637_v20 }
 0x8e7   : > { %3410 = vmatprep.subr.bf16.mxu1 %v3999_v2 }
 0x8ea   : > { %3411 = vmatpush3.bf16.msra.mxu1 %v3638_v21 }
 0x8eb   : > { %3424 = vmatprep.subr.bf16.mxu1 %v3999_v2 }
 0x9a5   : > { %v1761_v5 = vpop.f32.mrf.mxu1 }
 0x9a6   : > { %v1767_v6 = vpack.c.bf16 %v1761_v5, %v1761_v5 }
 0x9a7   : > { %v3400_v7 = vpop.f32.mrf.mxu1 }
 0x9a8   : > { %3405 = vmatmul.mubr.msk.bf16.vlgmr.msra.gmra.mxu0 %vm1183_vm3, %v1767_v6 }
 0x9a9   : > { %v1764_v8 = vpop.f32.mrf.mxu1  ;;  %3420 = vmatprep.mubr.msk.bf16.mxu0 %vm4000_vm1, %v3999_v2 }
 0x9ab   : > { %v3401_v9 = vpop.f32.mrf.mxu1 }
 0xa68   : > { %v1808_v11 = vpop.f32.mrf.mxu0 }
 0xa69   : > { %v1814_v13 = vadd.f32 %v1808_v11, %v1655_v58 }
 0xa6a   : > { %v3406_v14 = vpop.f32.mrf.mxu0 }
 0xa6b   : > { %v1822_v15 = vadd.f32 %v3219_v12, %v1814_v13 }
 0xa6c   : > { %v1811_v16 = vpop.f32.mrf.mxu0 }
 0xa6d   : > { %v1823_v17 = vadd.f32 %v1822_v15, %v4420_v4 }
 0xa6e   : > { %v3407_v18 = vpop.f32.mrf.mxu0 }
 0xa6f   : > { %v1824_v19 = vsel %vm1131_vm2, %v1823_v17, 0.0 }
 0xa70   : > { %1825 = vadd.xlane.f32.xlu1 %v1824_v19 }
 0xaf9   : > { %v1826_v22 = vpop.xlane.xlu1 %1825 }
 0xafa   : > { %v1828_v23 = vmul.f32 0.03125, %v1826_v22 }
 0xafc   : > { %v1829_v4 = vsub.f32 %v1823_v17, %v1828_v23 }
 0xafe   : > { %v1830_v24 = vmul.f32 %v1829_v4, %v1829_v4 }
 0xb00   : > { %v1831_v25 = vsel %vm1131_vm2, %v1830_v24, 0.0 }
 0xb01   : > { %1832 = vadd.xlane.f32.xlu1 %v1831_v25  ;;  %v1976_v25 = vld [vmem:[%s4389_s13 + $0x4] sm:$0xf] }
 0xb12   : > { %1924 = vrot.lane.b32.xlu1 %v3637_v20, %s4002_s29 }
 0xb8a   : > { %v1833_v27 = vpop.xlane.xlu1 %1832 }
 0xb8b   : > { %v1834_v28 = vmul.f32 0.03125, %v1833_v27 }
 0xb8d   : > { %v1835_v29 = vadd.f32 1e-05, %v1834_v28 }
 0xb8e   : > { %v1925_v30 = vpop.permute.xlu1 %1924 }
 0xb8f   : > { %3661 = vrsqrt.f32 %v1835_v29  ;;  %3417 = vmatpush3.bf16.msra.mxu0 %v1925_v30 }
 0xb90   : > { %3418 = vmatprep.subr.bf16.mxu0 %v3999_v2 }
 0xb93   : > { %3419 = vmatpush3.bf16.msra.mxu0 %v1923_v33 }
 0xb94   : > { %3430 = vmatprep.subr.bf16.mxu0 %v3999_v2 }
 0xb96   : > { %3421 = vmatmul.mubr.msk.bf16.vlgmr.msra.gmra.mxu0 %vm1131_vm2, %v1921_v34  ;;  %v2255_v34 = vsel %vm1248_vm4, %v1975_v31, 0 }
 0xb97   : > { %3432 = vmatprep.mubr.msk.bf16.mxu0 %vm4000_vm1, %v3999_v2 }
 0xb9c   : > { %v3662_v35 = vpop.eup %3661 }
 0xb9d   : > { %v1837_v37 = vmul.f32 %v3662_v35, %v1829_v4 }
 0xb9f   : > { %v1845_v39 = vmul.f32 %v3220_v36, %v1837_v37 }
 0xba1   : > { %v4560_v40 = vadd.f32 %v3221_v38, %v1845_v39 }
 0xba3   : > { %v1859_v41 = vpack.c.bf16 %v4560_v40, %v4560_v40 }
 0xba5   : > { %3413 = vmatmul.mubr.msk.bf16.vlgmr.msra.gmra.mxu1 %vm1131_vm2, %v1859_v41 }
 0xba6   : > { %3426 = vmatprep.mubr.msk.bf16.mxu1 %vm4000_vm1, %v3999_v2 }
 0xc56   : > { %v1968_v42 = vpop.f32.mrf.mxu0 }
 0xc57   : > { %v1969_v45 = vadd.f32 %v1968_v42, %v1929_v43 }
 0xc58   : > { %v3422_v44 = vpop.f32.mrf.mxu0 }
 0xc5a   : > { %v1971_v46 = vpop.f32.mrf.mxu0 }
 0xc5b   : > { %v1972_v47 = vadd.f32 %v1971_v46, %v1929_v43 }
 0xc5c   : > { %v3423_v48 = vpop.f32.mrf.mxu0 }
 0xc5d   : > { %v4567_v49 = vpack.c.bf16 %v1972_v47, %v1969_v45 }
 0xc5f   : > { %2095 = vrot.lane.b32.xlu0 %v4567_v49, %s4001_s26  ;;  %v1985_v50 = vsel %vm1183_vm3, %v4567_v49, 0 }
 0xc60   : > { %3425 = vmatpush3.bf16.xpose.msra.mxu1 %v1985_v50 }
 0xc61   : > { %3436 = vmatprep.subr.bf16.mxu1 %v3999_v2 }
 0xc65   : > { %v1915_v51 = vpop.f32.mrf.mxu1 }
 0xc66   : > { %v1916_v52 = vadd.f32 %v3222_v26, %v1915_v51  ;;  %v2209_v26 = vsel %vm1248_vm4, %v1976_v25, 0 }
 0xc67   : > { %v3414_v53 = vpop.f32.mrf.mxu1 }
 0xc68   : > { %v4574_v54 = vpack.c.bf16 %v1916_v52, %v1916_v52 }
 0xc69   : > { %v1918_v55 = vpop.f32.mrf.mxu1 }
 0xc6a   : > { %2093 = vrot.lane.b32.xlu1 %v4574_v54, %s4001_s26  ;;  %3427 = vmatmul.mubr.msk.bf16.vlgmr.msra.gmra.mxu1 %vm1183_vm3, %v4574_v54 }
 0xc6b   : > { %v3415_v56 = vpop.f32.mrf.mxu1  ;;  %3438 = vmatprep.mubr.msk.bf16.mxu1 %vm4000_vm1, %v3999_v2 }
 0xcd1   : > { %v2096_v57 = vpop.permute.xlu0 %2095 }
 0xcd2   : > { %v2101_v58 = vsel %vm1183_vm3, %v2096_v57, 0 }
 0xcd3   : > { %3437 = vmatpush3.bf16.xpose.msra.mxu1 %v2101_v58 }
 0xcd4   : > { %3448 = vmatprep.subr.bf16.mxu1 %v3999_v2 }
 0xcdc   : > { %v2094_v59 = vpop.permute.xlu1 %2093 }
 0xcdd   : > { %3439 = vmatmul.mubr.msk.bf16.vlgmr.msra.gmra.mxu1 %vm1183_vm3, %v2094_v59 }
 0xcde   : > { %3450 = vmatprep.mubr.msk.bf16.mxu1 %vm4000_vm1, %v3999_v2  ;;  %3449 = vmatpush3.bf16.msra.mxu1 %v2209_v26 }
 0xcdf   : > { %3460 = vmatprep.subr.bf16.mxu1 %v3999_v2 }
 0xd2a   : > { %v2021_v60 = vpop.f32.mrf.mxu1 }
 0xd2b   : > { %v2027_v10 = vmul.f32 0.35355338, %v2021_v60 }
 0xd2c   : > { %v3428_v61 = vpop.f32.mrf.mxu1 }
 0xd2d   : > { %v2029_v62 = vsel %vm2028_vm5, %v2027_v10, -inf }
 0xd2e   : > { %2030 = vmax.xlane.f32.xlu0 %v2029_v62  ;;  %v2024_v63 = vpop.f32.mrf.mxu1 }
 0xd30   : > { %v3429_v0 = vpop.f32.mrf.mxu1 }
 0xd9d   : > { %v2137_v1 = vpop.f32.mrf.mxu1 }
 0xd9e   : > { %v2143_v3 = vmul.f32 0.35355338, %v2137_v1 }
 0xd9f   : > { %v3440_v5 = vpop.f32.mrf.mxu1 }
 0xda0   : > { %v2144_v6 = vsel %vm2028_vm5, %v2143_v3, -inf }
 0xda1   : > { %2145 = vmax.xlane.f32.xlu1 %v2144_v6  ;;  %v2140_v7 = vpop.f32.mrf.mxu1 }
 0xda3   : > { %v3441_v8 = vpop.f32.mrf.mxu1 }
 0xdb2   : > { %2042 = vrot.lane.b32.xlu1 %v4567_v49, %s4002_s29  ;;  %s4834_s29 = scalar_lea.vmem [#allocation14], %s4316_s20 }
 0xdb6   : > { %2299 = vrot.lane.b32.xlu1 %v4567_v49, %s4006_s10 }
 0xdb7   : > { %v2031_v9 = vpop.xlane.xlu0 %2030 }
 0xdb8   : > { %v2032_v11 = vsub.f32 %v2027_v10, %v2031_v9 }
 0xdba   : > { %v2033_v12 = vmul.f32 1.442695, %v2032_v11  ;;  %2297 = vrot.lane.b32.xlu1 %v4574_v54, %s4006_s10 }
 0xdbc   : > { %3663 = vpow2.f32 %v2033_v12 }
 0xdc9   : > { %v3664_v13 = vpop.eup %3663 }
 0xdca   : > { %v2035_v14 = vsel %vm2028_vm5, %v3664_v13, 0.0 }
 0xdcb   : > { %2036 = vadd.xlane.f32.xlu0 %v2035_v14 }
 0xe2a   : > { %v2146_v15 = vpop.xlane.xlu1 %2145 }
 0xe2b   : > { %v2147_v16 = vsub.f32 %v2143_v3, %v2146_v15 }
 0xe2d   : > { %v2148_v17 = vmul.f32 1.442695, %v2147_v16  ;;  %v1977_v16 = vld [vmem:[%s4389_s13 + $0x8] sm:$0xf] }
 0xe2e   : > { %v2043_v18 = vpop.permute.xlu1 %2042 }
 0xe2f   : > { %3665 = vpow2.f32 %v2148_v17  ;;  %v2049_v19 = vsel %vm2047_vm6, %v2043_v18, 0  ;;  %v2413_v17 = vsel %vm1248_vm4, %v1977_v16, 0 }
 0xe30   : > { %3431 = vmatpush3.bf16.msra.mxu0 %v2049_v19 }
 0xe31   : > { %3442 = vmatprep.subr.bf16.mxu0 %v3999_v2 }
 0xe32   : > { %v2300_v41 = vpop.permute.xlu1 %2299 }
 0xe33   : > { %v2305_v45 = vsel %vm1183_vm3, %v2300_v41, 0 }
 0xe36   : > { %v2298_v48 = vpop.permute.xlu1 %2297 }
 0xe3c   : > { %v3666_v20 = vpop.eup %3665 }
 0xe3d   : > { %v2150_v21 = vsel %vm2028_vm5, %v3666_v20, 0.0 }
 0xe3e   : > { %2151 = vadd.xlane.f32.xlu0 %v2150_v21 }
 0xe54   : > { %v2037_v22 = vpop.xlane.xlu0 %2036  ;;  %2156 = vrot.lane.b32.xlu0 %v4567_v49, %s4003_s27 }
 0xe55   : > { %3667 = vrcp.f32 %v2037_v22 }
 0xe62   : > { %v3668_v23 = vpop.eup %3667 }
 0xe63   : > { %v2039_v4 = vmul.f32 %v3668_v23, %v3664_v13 }
 0xe65   : > { %v2040_v24 = vpack.c.bf16 %v2039_v4, %v2039_v4 }
 0xe67   : > { %3433 = vmatmul.mubr.msk.bf16.vlgmr.msra.gmra.mxu0 %vm2028_vm5, %v2040_v24 }
 0xe68   : > { %3444 = vmatprep.mubr.msk.bf16.mxu0 %vm4000_vm1, %v3999_v2 }
 0xec7   : > { %v2152_v27 = vpop.xlane.xlu0 %2151 }
 0xec8   : > { %3669 = vrcp.f32 %v2152_v27 }
 0xecb   : > { %v2157_v28 = vpop.permute.xlu0 %2156 }
 0xecc   : > { %v2162_v29 = vsel %vm2047_vm6, %v2157_v28, 0 }
 0xecd   : > { %3443 = vmatpush3.bf16.msra.mxu0 %v2162_v29 }
 0xece   : > { %3454 = vmatprep.subr.bf16.mxu0 %v3999_v2 }
 0xed5   : > { %v3670_v30 = vpop.eup %3669 }
 0xed6   : > { %v2154_v32 = vmul.f32 %v3670_v30, %v3666_v20 }
 0xed8   : > { %v2155_v33 = vpack.c.bf16 %v2154_v32, %v2154_v32 }
 0xeda   : > { %3445 = vmatmul.mubr.msk.bf16.vlgmr.msra.gmra.mxu0 %vm2028_vm5, %v2155_v33 }
 0xedb   : > { %3455 = vmatpush3.bf16.msra.mxu0 %v2255_v34  ;;  %3456 = vmatprep.mubr.msk.bf16.mxu0 %vm4000_vm1, %v3999_v2 }
 0xedc   : > { %3466 = vmatprep.subr.bf16.mxu0 %v3999_v2 }
 0xf27   : > { %v2085_v35 = vpop.f32.mrf.mxu0 }
 0xf28   : > { %v2091_v36 = vpack.c.bf16 %v2085_v35, %v2085_v35 }
 0xf29   : > { %v3434_v37 = vpop.f32.mrf.mxu0 }
 0xf2a   : > { %3457 = vmatmul.mubr.msk.bf16.vlgmr.msra.gmra.mxu0 %vm1183_vm3, %v2091_v36  ;;  %v1978_v37 = vld [vmem:[%s4389_s13 + $0xc] sm:$0xf]  ;;  %s4828_s13 = scalar_lea.vmem [#allocation5], %s4316_s20 }
 0xf2b   : > { %v2088_v38 = vpop.f32.mrf.mxu0  ;;  %3468 = vmatprep.mubr.msk.bf16.mxu0 %vm4000_vm1, %v3999_v2 }
 0xf2c   : > { %v2572_v38 = vsel %vm1248_vm4, %v1978_v37, 0 }
 0xf2d   : > { %v3435_v39 = vpop.f32.mrf.mxu0 }
 0xf9a   : > { %v2198_v42 = vpop.f32.mrf.mxu0 }
 0xf9b   : > { %v2204_v43 = vpack.c.bf16 %v2198_v42, %v2198_v42 }
 0xf9c   : > { %v3446_v44 = vpop.f32.mrf.mxu0 }
 0xf9d   : > { %3451 = vmatmul.mubr.msk.bf16.vlgmr.msra.gmra.mxu1 %vm1183_vm3, %v2204_v43 }
 0xf9e   : > { %3461 = vmatpush3.bf16.xpose.msra.mxu1 %v2305_v45  ;;  %v2201_v46 = vpop.f32.mrf.mxu0  ;;  %3462 = vmatprep.mubr.msk.bf16.mxu1 %vm4000_vm1, %v3999_v2 }
 0xf9f   : > { %3472 = vmatprep.subr.bf16.mxu1 %v3999_v2 }
 0xfa0   : > { %v3447_v47 = vpop.f32.mrf.mxu0 }
 0xfa5   : > { %3463 = vmatmul.mubr.msk.bf16.vlgmr.msra.gmra.mxu1 %vm1183_vm3, %v2298_v48 }
 0xfa6   : > { %3474 = vmatprep.mubr.msk.bf16.mxu1 %vm4000_vm1, %v3999_v2  ;;  %3473 = vmatpush3.bf16.msra.mxu1 %v2413_v17 }
 0xfa7   : > { %3484 = vmatprep.subr.bf16.mxu1 %v3999_v2 }
 0xfea   : > { %v4626_v50 = vpop.f32.mrf.mxu0 }
 0xfec   : > { %v3458_v51 = vpop.f32.mrf.mxu0 }
 0xfee   : > { %v2294_v52 = vpop.f32.mrf.mxu0 }
 0xff0   : > { %v3459_v53 = vpop.f32.mrf.mxu0 }
0x105d   : > { %v4628_v55 = vpop.f32.mrf.mxu1 }
0x105e   : > { %v2292_v33 = vadd.f32 %v4626_v50, %v4628_v55  ;;  %v3239_v55 = vld [vmem:[%s4828_s13] ss:$0 sm:$0xff] }
0x105f   : > { %v3452_v56 = vpop.f32.mrf.mxu1 }
0x1061   : > { %v2248_v57 = vpop.f32.mrf.mxu1 }
0x1063   : > { %v3453_v58 = vpop.f32.mrf.mxu1 }
0x1065   : > { %v2341_v59 = vpop.f32.mrf.mxu1 }
0x1066   : > { %v2347_v60 = vmul.f32 0.35355338, %v2341_v59 }
0x1067   : > { %v3464_v10 = vpop.f32.mrf.mxu1 }
0x1068   : > { %v2348_v61 = vsel %vm2028_vm5, %v2347_v60, -inf }
0x1069   : > { %2349 = vmax.xlane.f32.xlu0 %v2348_v61  ;;  %v2344_v62 = vpop.f32.mrf.mxu1 }
0x106b   : > { %v3465_v63 = vpop.f32.mrf.mxu1 }
0x107f   : > { %2360 = vrot.lane.b32.xlu0 %v4567_v49, %s4007_s8 }
0x1083   : > { %2456 = vrot.lane.b32.xlu0 %v4574_v54, %s4009_s7 }
0x10f2   : > { %v2350_v0 = vpop.xlane.xlu0 %2349 }
0x10f3   : > { %v2351_v1 = vsub.f32 %v2347_v60, %v2350_v0 }
0x10f5   : > { %v2352_v3 = vmul.f32 1.442695, %v2351_v1 }
0x10f6   : > { %v2361_v5 = vpop.permute.xlu0 %2360 }
0x10f7   : > { %3671 = vpow2.f32 %v2352_v3  ;;  %v2366_v6 = vsel %vm2047_vm6, %v2361_v5, 0  ;;  %v3639_v5 = vld [vmem:[%s4394_s21 + $0x8] sm:$0xff]  }
0x10f8   : > { %3467 = vmatpush3.bf16.msra.mxu0 %v2366_v6  ;;  %v3640_v6 = vld [vmem:[%s4394_s21] sm:$0xff]  }
0x10f9   : > { %3478 = vmatprep.subr.bf16.mxu0 %v3999_v2 }
0x10fa   : > { %v2457_v15 = vpop.permute.xlu0 %2456 }
0x1104   : > { %v3672_v7 = vpop.eup %3671 }
0x1105   : > { %v2354_v8 = vsel %vm2028_vm5, %v3672_v7, 0.0 }
0x1106   : > { %2355 = vadd.xlane.f32.xlu1 %v2354_v8 }
0x1117   : > { %2458 = vrot.lane.b32.xlu1 %v4567_v49, %s4009_s7 }
0x118f   : > { %v2356_v9 = vpop.xlane.xlu1 %2355 }
0x1190   : > { %3673 = vrcp.f32 %v2356_v9 }
0x1193   : > { %v2459_v12 = vpop.permute.xlu1 %2458 }
0x1194   : > { %v2464_v14 = vsel %vm1183_vm3, %v2459_v12, 0  ;;  %v3240_v12 = vld [vmem:[%s1088_s3] ss:$0 sm:$0xff]  ;;  %s4832_s3 = scalar_lea.vmem [#allocation8], %s4316_s20 }
0x119d   : > { %v3674_v54 = vpop.eup %3673 }
0x119e   : > { %v2358_v11 = vmul.f32 %v3674_v54, %v3672_v7  ;;  %v3642_v7 = vld [vmem:[%s4404_s30 + $0x10] sm:$0xff]  }
0x11a0   : > { %v2359_v13 = vpack.c.bf16 %v2358_v11, %v2358_v11 }
0x11a2   : > { %3469 = vmatmul.mubr.msk.bf16.vlgmr.msra.gmra.mxu0 %vm2028_vm5, %v2359_v13 }
0x11a3   : > { %3479 = vmatpush3.bf16.xpose.msra.mxu0 %v2464_v14  ;;  %3480 = vmatprep.mubr.msk.bf16.mxu0 %vm4000_vm1, %v3999_v2  ;;  %v3241_v14 = vld [vmem:[%s4830_s19] ss:$0 sm:$0xff] }
0x11a4   : > { %3490 = vmatprep.subr.bf16.mxu0 %v3999_v2 }
0x11aa   : > { %3481 = vmatmul.mubr.msk.bf16.vlgmr.msra.gmra.mxu0 %vm1183_vm3, %v2457_v15 }
0x11ab   : > { %3492 = vmatprep.mubr.msk.bf16.mxu0 %vm4000_vm1, %v3999_v2  ;;  %3491 = vmatpush3.bf16.msra.mxu0 %v2572_v38 }
0x11ac   : > { %3504 = vmatprep.subr.bf16.mxu0 %v3999_v2 }
0x1262   : > { %v2402_v18 = vpop.f32.mrf.mxu0 }
0x1263   : > { %v2408_v19 = vpack.c.bf16 %v2402_v18, %v2402_v18  ;;  %v3643_v18 = vld [vmem:[%s4404_s30 + $0x8] sm:$0xff]  }
0x1264   : > { %v3470_v20 = vpop.f32.mrf.mxu0 }
0x1265   : > { %3475 = vmatmul.mubr.msk.bf16.vlgmr.msra.gmra.mxu1 %vm1183_vm3, %v2408_v19  ;;  %v3644_v19 = vld [vmem:[%s4404_s30] sm:$0xff]  }
0x1266   : > { %v2405_v21 = vpop.f32.mrf.mxu0  ;;  %3486 = vmatprep.mubr.msk.bf16.mxu1 %vm4000_vm1, %v3999_v2  ;;  %v3242_v20 = vld [vmem:[%s4831_s22] ss:$0 sm:$0xff] }
0x1268   : > { %v3471_v22 = vpop.f32.mrf.mxu0 }
0x126a   : > { %v2500_v23 = vpop.f32.mrf.mxu0 }
0x126b   : > { %v2506_v4 = vmul.f32 0.35355338, %v2500_v23 }
0x126c   : > { %v3482_v24 = vpop.f32.mrf.mxu0 }
0x126d   : > { %v2507_v25 = vsel %vm2028_vm5, %v2506_v4, -inf }
0x126e   : > { %2508 = vmax.xlane.f32.xlu1 %v2507_v25  ;;  %v2503_v26 = vpop.f32.mrf.mxu0 }
0x1270   : > { %v3483_v27 = vpop.f32.mrf.mxu0 }
0x1271   : > { %v3246_v27 = vld [vmem:[%s4832_s3] ss:$0 sm:$0xff] }
0x12f7   : > { %v2509_v28 = vpop.xlane.xlu1 %2508 }
0x12f8   : > { %v2510_v29 = vsub.f32 %v2506_v4, %v2509_v28 }
0x12fa   : > { %v2511_v30 = vmul.f32 1.442695, %v2510_v29 }
0x12fc   : > { %3675 = vpow2.f32 %v2511_v30 }
0x1309   : > { %v3676_v31 = vpop.eup %3675 }
0x130a   : > { %v2513_v32 = vsel %vm2028_vm5, %v3676_v31, 0.0 }
0x130b   : > { %2514 = vadd.xlane.f32.xlu0 %v2513_v32 }
0x1321   : > { %2519 = vrot.lane.b32.xlu0 %v4567_v49, %s4008_s25 }
0x1325   : > { %v2449_v34 = vpop.f32.mrf.mxu1 }
0x1326   : > { %v2455_v35 = vadd.f32 %v2449_v34, %v2292_v33 }
0x1327   : > { %v3476_v36 = vpop.f32.mrf.mxu1 }
0x1329   : > { %v2452_v39 = vpop.f32.mrf.mxu1 }
0x132b   : > { %v3477_v41 = vpop.f32.mrf.mxu1 }
0x1394   : > { %v2515_v42 = vpop.xlane.xlu0 %2514 }
0x1395   : > { %3677 = vrcp.f32 %v2515_v42 }
0x1398   : > { %v2520_v43 = vpop.permute.xlu0 %2519 }
0x1399   : > { %v2525_v44 = vsel %vm2047_vm6, %v2520_v43, 0 }
0x139a   : > { %3485 = vmatpush3.bf16.msra.mxu1 %v2525_v44  ;;  %v3252_v44 = vld [vmem:[%s1091_s15] ss:$0 sm:$0xff] }
0x139b   : > { %3496 = vmatprep.subr.bf16.mxu1 %v3999_v2 }
0x13a2   : > { %v3678_v49 = vpop.eup %3677 }
0x13a3   : > { %v2517_v45 = vmul.f32 %v3678_v49, %v3676_v31 }
0x13a5   : > { %v2518_v46 = vpack.c.bf16 %v2517_v45, %v2517_v45  ;;  %v3253_v45 = vld [vmem:[%s4834_s29] ss:$0 sm:$0xff] }
0x13a7   : > { %3487 = vmatmul.mubr.msk.bf16.vlgmr.msra.gmra.mxu1 %vm2028_vm5, %v2518_v46 }
0x13a8   : > { %3500 = vmatprep.mubr.msk.bf16.mxu1 %vm4000_vm1, %v3999_v2  ;;  %3497 = vmatpush3.bf16.msra.mxu1 %v3639_v5 }
0x13a9   : > { %3498 = vmatprep.subr.bf16.mxu1 %v3999_v2 }
0x13ac   : > { %3499 = vmatpush3.bf16.msra.mxu1 %v3640_v6 }
0x1467   : > { %v2561_v47 = vpop.f32.mrf.mxu1 }
0x1468   : > { %v2567_v48 = vpack.c.bf16 %v2561_v47, %v2561_v47 }
0x1469   : > { %v3488_v50 = vpop.f32.mrf.mxu1 }
0x146a   : > { %3493 = vmatmul.mubr.msk.bf16.vlgmr.msra.gmra.mxu0 %vm1183_vm3, %v2567_v48 }
0x146b   : > { %v2564_v51 = vpop.f32.mrf.mxu1  ;;  %3512 = vmatprep.mubr.msk.bf16.mxu0 %vm4000_vm1, %v3999_v2 }
0x146d   : > { %v3489_v52 = vpop.f32.mrf.mxu1 }
0x152a   : > { %v2608_v53 = vpop.f32.mrf.mxu0 }
0x152b   : > { %v2614_v56 = vadd.f32 %v2608_v53, %v2455_v35 }
0x152c   : > { %v3494_v57 = vpop.f32.mrf.mxu0 }
0x152d   : > { %v2622_v58 = vadd.f32 %v3239_v55, %v2614_v56 }
0x152e   : > { %v2611_v59 = vpop.f32.mrf.mxu0 }
0x152f   : > { %v2623_v60 = vadd.f32 %v2622_v58, %v4560_v40  ;;  %v3641_v40 = vld [vmem:[%s4404_s30 + $0x18] sm:$0xff]  }
0x1530   : > { %v3495_v10 = vpop.f32.mrf.mxu0  ;;  %3505 = vmatpush3.bf16.msra.mxu0 %v3641_v40 }
0x1531   : > { %v2624_v61 = vsel %vm1131_vm2, %v2623_v60, 0.0  ;;  %3506 = vmatprep.subr.bf16.mxu0 %v3999_v2 }
0x1532   : > { %2625 = vadd.xlane.f32.xlu1 %v2624_v61 }
0x1534   : > { %3507 = vmatpush3.bf16.msra.mxu0 %v3642_v7 }
0x1535   : > { %3508 = vmatprep.subr.bf16.mxu0 %v3999_v2 }
0x1538   : > { %3509 = vmatpush3.bf16.msra.mxu0 %v3643_v18 }
0x1539   : > { %3510 = vmatprep.subr.bf16.mxu0 %v3999_v2 }
0x153c   : > { %3511 = vmatpush3.bf16.msra.mxu0 %v3644_v19 }
0x15bb   : > { %v2626_v62 = vpop.xlane.xlu1 %2625 }
0x15bc   : > { %v2627_v63 = vmul.f32 0.03125, %v2626_v62 }
0x15be   : > { %v2628_v0 = vsub.f32 %v2623_v60, %v2627_v63 }
0x15c0   : > { %v2629_v1 = vmul.f32 %v2628_v0, %v2628_v0 }
0x15c2   : > { %v2630_v3 = vsel %vm1131_vm2, %v2629_v1, 0.0 }
0x15c3   : > { %2631 = vadd.xlane.f32.xlu1 %v2630_v3 }
0x164c   : > { %v2632_v8 = vpop.xlane.xlu1 %2631 }
0x164d   : > { %v2633_v9 = vmul.f32 0.03125, %v2632_v8 }
0x164f   : > { %v2634_v54 = vadd.f32 1e-05, %v2633_v9 }
0x1651   : > { %3679 = vrsqrt.f32 %v2634_v54 }
0x165e   : > { %v3680_v11 = vpop.eup %3679 }
0x165f   : > { %v2636_v13 = vmul.f32 %v3680_v11, %v2628_v0 }
0x1661   : > { %v2644_v15 = vmul.f32 %v3240_v12, %v2636_v13 }
0x1663   : > { %v2652_v16 = vadd.f32 %v3241_v14, %v2644_v15 }
0x1665   : > { %v2657_v17 = vpack.c.bf16 %v2652_v16, %v2652_v16 }
0x1667   : > { %3501 = vmatmul.mubr.msk.bf16.vlgmr.msra.gmra.mxu1 %vm1131_vm2, %v2657_v17 }
0x1727   : > { %v2714_v21 = vpop.f32.mrf.mxu1 }
0x1728   : > { %v2715_v22 = vadd.f32 %v3242_v20, %v2714_v21 }
0x1729   : > { %v3502_v23 = vpop.f32.mrf.mxu1 }
0x172a   : > { %v2720_v4 = vmax.f32 %v2715_v22, 0.0 }
0x172b   : > { %v2717_v24 = vpop.f32.mrf.mxu1 }
0x172c   : > { %v2729_v25 = vpack.c.bf16 %v2720_v4, %v2720_v4 }
0x172d   : > { %v3503_v26 = vpop.f32.mrf.mxu1 }
0x172e   : > { %3513 = vmatmul.mubr.msk.bf16.vlgmr.msra.gmra.mxu0 %vm2761_vm7, %v2729_v25 }
0x17ee   : > { %v2799_v28 = vpop.f32.mrf.mxu0 }
0x17ef   : > { %v2800_v29 = vadd.f32 %v3246_v27, %v2799_v28 }
0x17f0   : > { %v3514_v30 = vpop.f32.mrf.mxu0 }
0x17f1   : > { %v2805_v31 = vadd.f32 %v2800_v29, %v2652_v16 }
0x17f2   : > { %v2802_v2 = vpop.f32.mrf.mxu0 }
0x17f3   : > { %v2806_v32 = vsel %vm1131_vm2, %v2805_v31, 0.0 }
0x17f4   : > { %2807 = vadd.xlane.f32.xlu1 %v2806_v32  ;;  %v3515_v33 = vpop.f32.mrf.mxu0 }
0x187d   : > { %v2808_v34 = vpop.xlane.xlu1 %2807 }
0x187e   : > { %v2809_v35 = vmul.f32 0.03125, %v2808_v34 }
0x1880   : > { %v2810_v36 = vsub.f32 %v2805_v31, %v2809_v35 }
0x1882   : > { %v2811_v37 = vmul.f32 %v2810_v36, %v2810_v36 }
0x1884   : > { %v2812_v38 = vsel %vm1131_vm2, %v2811_v37, 0.0 }
0x1885   : > { %2813 = vadd.xlane.f32.xlu1 %v2812_v38 }
0x190e   : > { %v2814_v39 = vpop.xlane.xlu1 %2813 }
0x190f   : > { %v2815_v41 = vmul.f32 0.03125, %v2814_v39 }
0x1911   : > { %v2816_v42 = vadd.f32 1e-05, %v2815_v41 }
0x1913   : > { %3681 = vrsqrt.f32 %v2816_v42 }
0x1920   : > { %v3682_v43 = vpop.eup %3681 }
0x1921   : > { %v2818_v49 = vmul.f32 %v3682_v43, %v2810_v36 }
0x1923   : > { %v2826_v46 = vmul.f32 %v3252_v44, %v2818_v49 }
0x1925   : > { %v2834_v47 = vadd.f32 %v3253_v45, %v2826_v46 }
0x1927   : > { %2835 = vst.msk [vmem:[#allocation2] sm:$0xff] %vm1131_vm2, %v2834_v47  ;;  %2836 = vst.msk [vmem:[%s4413_s6] sm:$0xff] %vm1131_vm2, %v2834_v47 }
0x1928 PF: > { %s4835_s27 = sld [smem:[#allocation25_spill]] }
0x1929   : > { %s4836_s1 = sld [smem:[#allocation21_spill]] }
0x192a   : > { %s4837_s22 = sld [smem:[#allocation22_spill]] }
0x192b   : > { %s4838_s23 = sld [smem:[#allocation28_spill]] }
0x192c   : > { %s4839_s24 = sld [smem:[#allocation23_spill]] }
0x192d   : > { %s4840_s2 = sld [smem:[#allocation24_spill]] }
0x192e   : > { %s45_s26 = sadd.s32 1, %s4835_s27   ;;  %s4841_s25 = sld [smem:[#allocation26_spill]] }
0x192f   : > { %p42_p7 = scmp.ge.s32.totalorder %s45_s26, 6   ;;  %s4842_s3 = sld [smem:[#allocation27_spill]] }
0x1931   :  { %44 = sbr.rel (!%p42_p7) target bundleno = 35 (0x23), region = 265 }
0x1936   :  { %2856 = vsyncpa [#allocation4], 1 }
0x1937   :  { %2858 = vsyncpa [#allocation4 + $0x1], 1 }
0x1938   :  { %2859 = vsyncpa [#allocation6], 1 }
0x1939   :  { %2861 = vsyncpa [#allocation6 + $0x1], 1 }
0x193a   :  { %2862 = vsyncpa [#allocation9], 1 }
0x193b   :  { %2864 = vsyncpa [#allocation9 + $0x1], 1 }
0x193c   :  { %2865 = vsyncpa [#allocation12], 1 }
0x193d   :  { %2867 = vsyncpa [#allocation12 + $0x1], 1 }
0x193e   :  { %2868 = vsyncpa [#allocation15], 1 }
0x193f   :  { %2870 = vsyncpa [#allocation15 + $0x1], 1 }

</bundles_post_ra>
